<compile_context>
chip_gen: v6e
topology: v6e:2x2x1
jax: 0.10.0
libtpu: 0.0.40
codegen_flags: <defaults>
</compile_context>

<pallas_src>
import functools

import numpy as np

import jax
import jax.numpy as jnp
from jax.experimental import pallas as pl
from jax.experimental.pallas import tpu as pltpu

# bare couplings (deterministic, in-script "parameters")
M_SQ = -4.0
LAM = 6.975
USE_ARXIV_VERSION = False


def phi4_action_kernel(phi_ref, m_ref, w_ref, out_ref, *, kappa, lam):
    """One batch tile: phi_ref (TILE_N, sites) -> out_ref (TILE_N, 1).

    m_ref (sites, sites) and w_ref (sites, 1) are grid-invariant, VMEM-resident
    constants (neighbour/scatter matrix with version_factor folded in, and a
    ones column for the per-state site reduction).
    """
    phi_in = phi_ref[...]                                  # native dtype

    # Interaction gather on the MXU (version_factor already folded into M):
    #   nbr[n, s] = vf * (phi[n, up(s)] + phi[n, right(s)])
    # f32 inputs need HIGHEST precision so the gather is exact (weights are
    # 0/1/vf); bf16 inputs are exact in a single default-precision pass.
    gather_prec = (jax.lax.Precision.HIGHEST
                   if phi_in.dtype == jnp.float32 else jax.lax.Precision.DEFAULT)
    nbr = jnp.dot(phi_in, m_ref[...],
                  preferred_element_type=jnp.float32, precision=gather_prec)

    phi = phi_in.astype(jnp.float32)
    phi2 = phi * phi
    # on-site polynomial: vf*(2 + 0.5*m_sq)*phi^2 + lam*phi^4
    poly = phi2 * (lam * phi2 + kappa) if kappa != 0.0 else lam * (phi2 * phi2)
    acc = poly - phi * nbr

    # per-state site sum on the MXU as well (ones column resident in VMEM);
    # HIGHEST keeps the f32 accumulator exact through the multi-pass matmul.
    out_ref[...] = jnp.dot(acc, w_ref[...],
                           preferred_element_type=jnp.float32,
                           precision=jax.lax.Precision.HIGHEST)


def _neighbour_matrix(length, vf, dtype):
    """(sites, sites) matrix with M[up(s), s] = M[right(s), s] = vf so that
    (phi @ M)[n, s] = vf * (phi[n, shift0(s)] + phi[n, shift1(s)])."""
    sites = length * length
    idx = np.arange(sites).reshape(length, length)
    up = np.roll(idx, -1, axis=0).reshape(-1)       # +1 in lattice dim 0
    right = np.roll(idx, -1, axis=1).reshape(-1)    # +1 in lattice dim 1
    cols = np.arange(sites)
    m = np.zeros((sites, sites), np.float32)
    m[up, cols] += vf        # up/right are permutations -> no duplicate pairs
    m[right, cols] += vf
    return jnp.asarray(m, dtype=dtype)


def _sublane(dtype):
    """Sublane packing multiple for the dtype: 8 (f32), 16 (bf16), 32 (int8)."""
    return max(8, 32 // jnp.dtype(dtype).itemsize)


def _round_up(x, m):
    return -(-int(x) // m) * m


def _pick_tile_n(n, sites, dtype):
    """Batch tile: ~4 MiB input blocks, bounded so the double-buffered input
    plus ~4 f32 block-sized temporaries stay under ~24 MiB of live VMEM
    (safe under v7x's 32 MiB scoped default / 64 MiB physical), while keeping
    >= 4 grid steps (>= 2 per v7x TensorCore) when there is enough work."""
    sub = _sublane(dtype)
    in_bytes = jnp.dtype(dtype).itemsize
    per_row = 2 * sites * in_bytes + 4 * sites * 4
    cap = max(sub, ((24 << 20) // per_row) // sub * sub)
    if n >= 4 * sub:
        tile = min(cap, _round_up(-(-n // 4), sub))   # >= 4 grid steps
    else:
        tile = min(cap, _round_up(n, sub))
    return max(sub, tile)


def phi_four_action(phi_state, *, length, m_sq, lam,
                    use_arxiv_version=False, tile_n=None, input_dtype=None):
    """phi_state: (N, length*length) -> (N, 1) action per state."""
    vf = 2.0 if use_arxiv_version else 1.0
    if input_dtype is not None:
        # Optional HBM-traffic halving (recommended on v5e/v6e); in-kernel
        # arithmetic stays f32.
        phi_state = phi_state.astype(input_dtype)

    n, sites = phi_state.shape
    assert sites == length * length

    # MXU operand dtype: bf16 stays bf16 (exact, single pass); anything else
    # runs in f32 (multi-pass MXU, exact for 0/1/vf weights).
    if phi_state.dtype == jnp.bfloat16:
        mat_dtype = jnp.bfloat16
    else:
        if phi_state.dtype != jnp.float32:
            phi_state = phi_state.astype(jnp.float32)
        mat_dtype = jnp.float32

    sublane = _sublane(phi_state.dtype)
    if tile_n is None:
        tile_n = _pick_tile_n(n, sites, phi_state.dtype)
    tile_n = max(sublane, (int(tile_n) // sublane) * sublane)

    # zero-pad the batch to a tile multiple: padded rows are sliced off below
    # and the neighbour matmul never mixes states, so padding is exact.
    n_pad = (-n) % tile_n
    phi_in = phi_state
    if n_pad:
        phi_in = jnp.concatenate(
            [phi_in, jnp.zeros((n_pad, sites), phi_in.dtype)], axis=0)
    n_total = n + n_pad

    nbr_mat = _neighbour_matrix(length, vf, mat_dtype)
    ones_col = jnp.ones((sites, 1), jnp.float32)

    kernel = functools.partial(
        phi4_action_kernel,
        kappa=float(vf * (2.0 + 0.5 * m_sq)), lam=float(lam))

    out = pl.pallas_call(
        kernel,
        out_shape=jax.ShapeDtypeStruct((n_total, 1), jnp.float32),
        grid=(n_total // tile_n,),
        in_specs=[pl.BlockSpec((tile_n, sites), lambda i: (i, 0)),
                  pl.BlockSpec((sites, sites), lambda i: (0, 0)),  # resident M
                  pl.BlockSpec((sites, 1), lambda i: (0, 0))],     # resident 1s
        out_specs=pl.BlockSpec((tile_n, 1), lambda i: (i, 0)),
        compiler_params=pltpu.CompilerParams(
            dimension_semantics=("parallel",),
            vmem_limit_bytes=30 << 20),
    )(phi_in, nbr_mat, ones_col)

    return out[:n] if n_pad else out


def _reference_action(phi, length, m_sq, lam, vf):
    """Pure-JAX reference following the torch formula with explicit shifts."""
    idx = jnp.arange(length * length).reshape(length, length)
    shift = jnp.stack([jnp.roll(idx, -1, axis=0).reshape(-1),   # +1 in dim 0
                       jnp.roll(idx, -1, axis=1).reshape(-1)])  # +1 in dim 1
    return (vf * (2.0 + 0.5 * m_sq) * phi ** 2 + lam * phi ** 4
            - vf * jnp.sum(phi[:, shift] * phi[:, None, :], axis=1)
            ).sum(axis=1, keepdims=True)


if __name__ == "__main__":
    L = 16                                  # geometry.length
    vf = 2.0 if USE_ARXIV_VERSION else 1.0
    key = jax.random.PRNGKey(0)

    # f32 path: one batch that tiles evenly, one ragged (exercises padding)
    for n in (64, 50):
        key, sk = jax.random.split(key)
        phi = jax.random.normal(sk, (n, L * L), dtype=jnp.float32)

        out = jax.block_until_ready(
            phi_four_action(phi, length=L, m_sq=M_SQ, lam=LAM,
                            use_arxiv_version=USE_ARXIV_VERSION))

        ref = _reference_action(phi, L, M_SQ, LAM, vf)
        assert out.shape == (n, 1)
        assert jnp.allclose(out, ref, rtol=1e-5, atol=1e-3), (
            n, float(jnp.max(jnp.abs(out - ref))))

    # arXiv-version + nonzero kappa path (vf = 2 folded into M)
    key, sk = jax.random.split(key)
    phi = jax.random.normal(sk, (32, L * L), dtype=jnp.float32)
    out = jax.block_until_ready(
        phi_four_action(phi, length=L, m_sq=1.25, lam=LAM,
                        use_arxiv_version=True))
    ref = _reference_action(phi, L, 1.25, LAM, 2.0)
    assert jnp.allclose(out, ref, rtol=1e-5, atol=1e-3), (
        float(jnp.max(jnp.abs(out - ref))))

    # bf16-input path (halves HBM traffic; arithmetic stays f32 in-kernel).
    key, sk = jax.random.split(key)
    phi = jax.random.normal(sk, (64, L * L), dtype=jnp.float32)
    out = jax.block_until_ready(
        phi_four_action(phi, length=L, m_sq=M_SQ, lam=LAM,
                        use_arxiv_version=USE_ARXIV_VERSION,
                        input_dtype=jnp.bfloat16))
    ref = _reference_action(phi.astype(jnp.bfloat16).astype(jnp.float32),
                            L, M_SQ, LAM, vf)
    assert jnp.allclose(out, ref, rtol=1e-4, atol=1e-2), (
        float(jnp.max(jnp.abs(out - ref))))

    print("KERNEL_OK")
</pallas_src>

<mosaic_0001>
module attributes {stable_mosaic.version = 11 : i64} {
  func.func @phi4_action_kernel(%arg0: i32, %arg1: memref<16x256xf32, #tpu.memory_space<vmem>>, %arg2: memref<256x256xf32, #tpu.memory_space<vmem>>, %arg3: memref<256x1xf32, #tpu.memory_space<vmem>>, %arg4: memref<16x1xf32, #tpu.memory_space<vmem>>) attributes {dimension_semantics = [#tpu.dimension_semantics<parallel>], iteration_bounds = array<i64: 4>, scalar_prefetch = 0 : i64, scratch_operands = 0 : i64, tpu.core_type = #tpu.core_type<tc>, window_params = [{transform_indices = @transform_0, window_bounds = array<i64: 16, 256>}, {pipeline_mode = #tpu.pipeline_mode<synchronous>, transform_indices = @transform_1, window_bounds = array<i64: 256, 256>}, {pipeline_mode = #tpu.pipeline_mode<synchronous>, transform_indices = @transform_2, window_bounds = array<i64: 256, 1>}, {transform_indices = @transform_3, window_bounds = array<i64: 16, 1>}]} {
    %c0 = arith.constant 0 : index
    %c0_0 = arith.constant 0 : index
    %0 = vector.load %arg1[%c0, %c0_0] : memref<16x256xf32, #tpu.memory_space<vmem>>, vector<16x256xf32>
    %c0_1 = arith.constant 0 : index
    %c0_2 = arith.constant 0 : index
    %1 = vector.load %arg2[%c0_1, %c0_2] : memref<256x256xf32, #tpu.memory_space<vmem>>, vector<256x256xf32>
    %cst = arith.constant dense<0.000000e+00> : vector<16x256xf32>
    %2 = tpu.matmul %0, %1, %cst {dimension_numbers = #tpu.dot_dimension_numbers<[1], [0], [0], [1], [0, 0, 1, 1], [], []>, precision = #tpu.contract_precision<fp32>} : vector<16x256xf32>, vector<256x256xf32>, vector<16x256xf32> -> vector<16x256xf32>
    %3 = arith.mulf %0, %0 : vector<16x256xf32>
    %4 = arith.mulf %3, %3 : vector<16x256xf32>
    %cst_3 = arith.constant 6.975000e+00 : f32
    %5 = vector.broadcast %cst_3 : f32 to vector<16x256xf32>
    %6 = arith.mulf %5, %4 : vector<16x256xf32>
    %7 = arith.mulf %0, %2 : vector<16x256xf32>
    %8 = arith.subf %6, %7 : vector<16x256xf32>
    %c0_4 = arith.constant 0 : index
    %c0_5 = arith.constant 0 : index
    %9 = vector.load %arg3[%c0_4, %c0_5] : memref<256x1xf32, #tpu.memory_space<vmem>>, vector<256x1xf32>
    %cst_6 = arith.constant dense<0.000000e+00> : vector<16x1xf32>
    %10 = tpu.matmul %8, %9, %cst_6 {dimension_numbers = #tpu.dot_dimension_numbers<[1], [0], [0], [1], [0, 0, 1, 1], [], []>, precision = #tpu.contract_precision<fp32>} : vector<16x256xf32>, vector<256x1xf32>, vector<16x1xf32> -> vector<16x1xf32>
    %c0_7 = arith.constant 0 : index
    %c0_8 = arith.constant 0 : index
    %11 = vector.load %arg4[%c0_7, %c0_8] : memref<16x1xf32, #tpu.memory_space<vmem>>, vector<16x1xf32>
    tpu.vector_store %arg4[%c0_7, %c0_8], %10 {strides = array<i32>} : memref<16x1xf32, #tpu.memory_space<vmem>>, vector<16x1xf32>,
    return
  }
  func.func @transform_0(%arg0: i32) -> (i32, i32) {
    %c0_i32 = arith.constant 0 : i32
    %c0_i32_0 = arith.constant 0 : i32
    return %arg0, %c0_i32 : i32, i32
  }
  func.func @transform_1(%arg0: i32) -> (i32, i32) {
    %c0_i32 = arith.constant 0 : i32
    %c0_i32_0 = arith.constant 0 : i32
    %c0_i32_1 = arith.constant 0 : i32
    return %c0_i32, %c0_i32_0 : i32, i32
  }
  func.func @transform_2(%arg0: i32) -> (i32, i32) {
    %c0_i32 = arith.constant 0 : i32
    %c0_i32_0 = arith.constant 0 : i32
    %c0_i32_1 = arith.constant 0 : i32
    return %c0_i32, %c0_i32_0 : i32, i32
  }
  func.func @transform_3(%arg0: i32) -> (i32, i32) {
    %c0_i32 = arith.constant 0 : i32
    %c0_i32_0 = arith.constant 0 : i32
    return %arg0, %c0_i32 : i32, i32
  }
}

</mosaic_0001>

<bundles_post_ra>
// kernel: tpu_custom_call.1
= control target key start
LH: loop header
LB: loop body
LE: loop exit
PB: predicated region body
PF: predicated region fallthrough
CT: control target
= control target key end

     0   :  { %8 = vsyncpa [#allocation3], 0  ;;  %s2976_s12 = smov 0   ;;  %s4911_s0 = inlined_call_operand.vmem [shape: f32[64,256], index: 0, kind: input, shape index: {}]   ;;  %s4912_s1 = inlined_call_operand.hbm [shape: f32[256,256], index: 1, kind: input, shape index: {}]   ;;  %s4913_s2 = inlined_call_operand.vmem [shape: f32[256,1], index: 2, kind: input, shape index: {}]   ;;  %s4914_s3 = inlined_call_operand.vmem [shape: f32[64,1], index: 3, kind: output, shape index: {}]  }
   0x1 LB: > { %s2647_s13 = sadd.s32 4294967295, %s2951_s12   ;;  %p2649_p0 = scmp.ge.s32.totalorder %s2951_s12, 1  ;;  %s2951_s12 = sphi %s2976_s12, %s14_s12  }
   0x2   : > { %p113_p1 = scmp.lt.s32.totalorder %s2951_s12, 5  ;;  %s2953_s14 = smov [#allocation2]  }
   0x3   : > { %s125_s15 = sshll.u32 %s2953_s14, 4  ;;  %p2990_p3 = scmp.eq.s32.totalorder %s2647_s13, 0  ;;  %s126_s15 = int_to_ptr.vmem [resolvable:$true] %s125_s15 }
   0x4   : > { %p2984_p2 = pnand %p2649_p0, %p113_p1  ;;  %s2926_s18 = scalar_lea.vmem %s126_s15, 8192 }
   0x5   : > { %p2927_p7 = scmp.ne.s32.totalorder %s126_s15, %s2926_s18  ;;  %p2934_p10 = scmp.lt.s32.totalorder %s126_s15, %s126_s15 }
   0x6   : > { %p2894_p4 = pneg %p2984_p2  ;;  %p2935_p11 = scmp.lt.s32.totalorder %s2926_s18, %s2926_s18 }
   0x8   : > { %p2895_p5 = pnand %p2990_p3, %p2894_p4  ;;  %p2936_p12 = por %p2935_p11, %p2934_p10 }
   0xa   : > { %p2917_p6 = pneg %p2895_p5 }
   0xc   : > { %p2929_p8 = pnand %p2927_p7, %p2917_p6 }
   0xe   : > { %p2930_p9 = pneg %p2929_p8 }
  0x10   : > { %p2937_p13 = pnand %p2936_p12, %p2930_p9 }
  0x12   : > { %2940 = shalt.err (!%p2937_p13)
}
  0x13   : > { %s2954_s19 = smov 256   ;;  %s2955_s20 = smov 16  }
  0x14   : > { %2897 = dma.hbm_to_vmem [thread:$0]  (!%p2895_p5), %s4912_s1, 8192, %s126_s15, [#allocation3], %s2954_s19, %s2954_s19, %s2955_s20  }
  0x15   : > { %154 = sbr.rel (%p2984_p2) target bundleno = 746 (0x2ea), region = 32 }
  0x1a   : > { %2946 = dma.done.wait (%p2990_p3), [#allocation3], 8192  }
  0x1b   : > { %2948 = vsyncadd (%p2990_p3), [#allocation3], 4294959104  ;;  %v227_v0 = vld [vmem:[#allocation2 + $0xf8] sm:$0xff]  ;;  %v226_v1 = vld [vmem:[#allocation2 + $0xf0] sm:$0xff]  ;;  %s3584_s23 = sshll.u32 %s2647_s13, 1  ;;  %vm2576_vm0 = vcmask 7168  }
  0x1c   : > { %v225_v2 = vld [vmem:[#allocation2 + $0xe8] sm:$0xff]  ;;  %v3007_v3 = vand.u32 4294901760, %v227_v0  ;;  %v3009_v4 = vand.u32 4294901760, %v226_v1  ;;  %v224_v6 = vld [vmem:[#allocation2 + $0xe0] sm:$0xff]  ;;  %v223_v7 = vld [vmem:[#allocation2 + $0xd8] sm:$0xff]  ;;  %p180_p0 = scmp.lt.s32.totalorder %s3584_s23, 7 }
  0x1d   : > { %v3011_v5 = vand.u32 4294901760, %v225_v2  ;;  %v222_v8 = vld [vmem:[#allocation2 + $0xd0] sm:$0xff]  ;;  %v3013_v9 = vand.u32 4294901760, %v224_v6  ;;  %v3015_v10 = vand.u32 4294901760, %v223_v7  ;;  %v221_v12 = vld [vmem:[#allocation2 + $0xc8] sm:$0xff]  ;;  %v220_v13 = vld [vmem:[#allocation2 + $0xc0] sm:$0xff] }
  0x1e   : > { %v3017_v11 = vand.u32 4294901760, %v222_v8  ;;  %v219_v14 = vld [vmem:[#allocation2 + $0xb8] sm:$0xff]  ;;  %261 = vmatprep.subr.mxu0 %v3007_v3  ;;  %v3020_v15 = vand.u32 4294901760, %v221_v12  ;;  %v3022_v16 = vand.u32 4294901760, %v220_v13  ;;  %v3027_v18 = vsub.f32 %v227_v0, %v3007_v3  ;;  %v3029_v19 = vld [vmem:[#allocation2 + $0xb0] sm:$0xff]  ;;  %v3031_v20 = vld [vmem:[#allocation2 + $0xa8] sm:$0xff] }
  0x1f   : > { %v3024_v17 = vand.u32 4294901760, %v219_v14  ;;  %v3033_v21 = vld [vmem:[#allocation2 + $0xa0] sm:$0xff]  ;;  %263 = vmatpush1.msra.mxu0 %v3009_v4  ;;  %v3037_v22 = vand.u32 4294901760, %v3029_v19  ;;  %v3040_v23 = vsub.f32 %v226_v1, %v3009_v4  ;;  %v3043_v24 = vand.u32 4294901760, %v3031_v20  ;;  %v3048_v26 = vld [vmem:[#allocation2 + $0x98] sm:$0xff]  ;;  %v3050_v27 = vld [vmem:[#allocation2 + $0x90] sm:$0xff] }
  0x20   : > { %v3046_v25 = vsub.f32 %v225_v2, %v3011_v5  ;;  %v3052_v28 = vld [vmem:[#allocation2 + $0x88] sm:$0xff]  ;;  %265 = vmatprep.subr.mxu0 %v3011_v5  ;;  %v4928_v29 = vand.u32 4294901760, %v3027_v18  ;;  %v3057_v30 = vand.u32 4294901760, %v3033_v21  ;;  %v3060_v31 = vsub.f32 %v224_v6, %v3013_v9  ;;  %v3074_v37 = vld [vmem:[#allocation2 + $0x80] sm:$0xff]  ;;  %v3098_v46 = vld [vmem:[#allocation2 + $0x78] sm:$0xff]  ;;  %s5719_s23 = smov (!%p180_p0, %s3584_s23), 7 }
  0x21   : > { %5246 = vst [vmem:[#allocation5_spill] sm:$0xff] %v3043_v24  ;;  %v3063_v32 = vand.u32 4294901760, %v3048_v26  ;;  %267 = vmatpush1.msra.mxu0 %v3013_v9  ;;  %v4926_v33 = vand.u32 4294901760, %v3040_v23  ;;  %v3069_v35 = vsub.f32 %v223_v7, %v3015_v10  ;;  %v3072_v36 = vand.u32 4294901760, %v3050_v27  ;;  %v3108_v51 = vld [vmem:[#allocation2 + $0x70] sm:$0xff]  ;;  %v3115_v56 = vld [vmem:[#allocation2 + $0x68] sm:$0xff] }
  0x22   : > { %5247 = vst [vmem:[#allocation6_spill] sm:$0xff] %v3057_v30  ;;  %v4925_v34 = vand.u32 4294901760, %v3046_v25  ;;  %269 = vmatprep.subr.mxu0 %v3015_v10  ;;  %v424_v38 = vsub.f32 %v3027_v18, %v4928_v29  ;;  %v4923_v39 = vand.u32 4294901760, %v3060_v31  ;;  %v3082_v40 = vsub.f32 %v222_v8, %v3017_v11  ;;  %v3127_v61 = vld [vmem:[#allocation2 + $0x60] sm:$0xff]  ;;  %v3139_v2 = vld [vmem:[#allocation2 + $0x58] sm:$0xff]  ;;  %s2661_s24 = sshll.u32 %s5719_s23, 4 }
  0x23   : > { %5248 = vst [vmem:[#allocation7_spill] sm:$0xff] %v3063_v32  ;;  %5249 = vst [vmem:[#allocation8_spill] sm:$0xff] %v3072_v36  ;;  %v3085_v41 = vand.u32 4294901760, %v3052_v28  ;;  %271 = vmatpush1.msra.mxu0 %v3017_v11  ;;  %v430_v42 = vsub.f32 %v3040_v23, %v4926_v33  ;;  %v4921_v44 = vand.u32 4294901760, %v3069_v35  ;;  %v3096_v45 = vsub.f32 %v221_v12, %v3020_v15  ;;  %s3755_s27 = scalar_lea.vmem %s4911_s0, %s2661_s24 }
  0x24   : > { %v436_v43 = vsub.f32 %v3046_v25, %v4925_v34  ;;  %273 = vmatprep.subr.mxu0 %v3020_v15  ;;  %v425_v47 = vand.u32 4294901760, %v424_v38  ;;  %v442_v48 = vsub.f32 %v3060_v31, %v4923_v39  ;;  %v4920_v49 = vand.u32 4294901760, %v3082_v40  ;;  %v3230_v39 = vld [vmem:[#allocation2 + $0x28] sm:$0xff]  ;;  %v3240_v34 = vld [vmem:[#allocation2 + $0x20] sm:$0xff] }
  0x25   : > { %5250 = vst [vmem:[#allocation9_spill] sm:$0xff] %v3085_v41  ;;  %v3106_v50 = vand.u32 4294901760, %v3074_v37  ;;  %275 = vmatpush1.msra.mxu0 %v3022_v16  ;;  %v431_v52 = vand.u32 4294901760, %v430_v42  ;;  %v448_v54 = vsub.f32 %v3069_v35, %v4921_v44  ;;  %v4918_v55 = vand.u32 4294901760, %v3096_v45 }
  0x26   : > { %v437_v53 = vand.u32 4294901760, %v436_v43  ;;  %277 = vmatprep.subr.mxu0 %v3024_v17  ;;  %426 = vmatprep.subr.mxu1 %v425_v47  ;;  %v443_v57 = vand.u32 4294901760, %v442_v48  ;;  %v454_v58 = vsub.f32 %v3082_v40, %v4920_v49  ;;  %v3122_v59 = vsub.f32 %v220_v13, %v3022_v16  ;;  %v3150_v13 = vld [vmem:[#allocation2 + $0x50] sm:$0xff] }
  0x27   : > { %5251 = vst [vmem:[#allocation10_spill] sm:$0xff] %v3106_v50  ;;  %v3125_v60 = vand.u32 4294901760, %v3098_v46  ;;  %279 = vmatpush1.msra.mxu0 %v3037_v22  ;;  %432 = vmatpush1.msra.mxu1 %v431_v52  ;;  %v449_v62 = vand.u32 4294901760, %v448_v54  ;;  %v460_v63 = vsub.f32 %v3096_v45, %v4918_v55  ;;  %v3134_v0 = vsub.f32 %v219_v14, %v3024_v17  ;;  %v3217_v49 = vld [vmem:[#allocation2 + $0x30] sm:$0xff] }
  0x28   : > { %v3137_v1 = vand.u32 4294901760, %v3108_v51  ;;  %281 = vmatprep.subr.mxu0 %v3043_v24  ;;  %438 = vmatprep.subr.mxu1 %v437_v53  ;;  %v455_v6 = vand.u32 4294901760, %v454_v58  ;;  %v4916_v7 = vand.u32 4294901760, %v3122_v59  ;;  %v3145_v8 = vsub.f32 %v3029_v19, %v3037_v22 }
  0x29   : > { %5252 = vst [vmem:[#allocation11_spill] sm:$0xff] %v3125_v60  ;;  %v3148_v12 = vand.u32 4294901760, %v3115_v56  ;;  %283 = vmatpush1.msra.mxu0 %v3057_v30  ;;  %444 = vmatpush1.msra.mxu1 %v443_v57  ;;  %v461_v14 = vand.u32 4294901760, %v460_v63  ;;  %v4915_v38 = vand.u32 4294901760, %v3134_v0  ;;  %v3156_v42 = vsub.f32 %v3031_v20, %v3043_v24  ;;  %v3173_v20 = vld [vmem:[#allocation2 + $0x48] sm:$0xff] }
  0x2a   : > { %5253 = vst [vmem:[#allocation12_spill] sm:$0xff] %v3137_v1  ;;  %v3159_v43 = vand.u32 4294901760, %v3127_v61  ;;  %285 = vmatprep.subr.mxu0 %v3063_v32  ;;  %450 = vmatprep.subr.mxu1 %v449_v62  ;;  %v466_v19 = vsub.f32 %v3122_v59, %v4916_v7  ;;  %v4917_v47 = vand.u32 4294901760, %v3145_v8  ;;  %v3168_v48 = vsub.f32 %v3033_v21, %v3057_v30 }
  0x2b   : > { %5254 = vst [vmem:[#allocation13_spill] sm:$0xff] %v3148_v12  ;;  %v3171_v52 = vand.u32 4294901760, %v3139_v2  ;;  %287 = vmatpush1.msra.mxu0 %v3072_v36  ;;  %456 = vmatpush1.msra.mxu1 %v455_v6  ;;  %v472_v53 = vsub.f32 %v3134_v0, %v4915_v38  ;;  %v4919_v54 = vand.u32 4294901760, %v3156_v42  ;;  %v3182_v57 = vsub.f32 %v3048_v26, %v3063_v32  ;;  %v3196_v38 = vld [vmem:[#allocation2 + $0x40] sm:$0xff] }
  0x2c   : > { %5255 = vst [vmem:[#allocation14_spill] sm:$0xff] %v3159_v43  ;;  %v3185_v21 = vand.u32 4294901760, %v3150_v13  ;;  %289 = vmatprep.subr.mxu0 %v3085_v41  ;;  %462 = vmatprep.subr.mxu1 %v461_v14  ;;  %v467_v58 = vand.u32 4294901760, %v466_v19  ;;  %v478_v62 = vsub.f32 %v3145_v8, %v4917_v47  ;;  %v4922_v63 = vand.u32 4294901760, %v3168_v48  ;;  %v3206_v47 = vld [vmem:[#allocation2 + $0x38] sm:$0xff] }
  0x2d   : > { %5256 = vst [vmem:[#allocation15_spill] sm:$0xff] %v3171_v52  ;;  %v3194_v6 = vsub.f32 %v3050_v27, %v3072_v36  ;;  %291 = vmatpush1.msra.mxu0 %v3106_v50  ;;  %v473_v26 = vand.u32 4294901760, %v472_v53  ;;  %v484_v14 = vsub.f32 %v3156_v42, %v4919_v54  ;;  %v4924_v19 = vand.u32 4294901760, %v3182_v57  ;;  %v3320_v36 = vld [vmem:[#allocation2 + $0x1f8] sm:$0xff] }
  0x2e   : > { %5257 = vst [vmem:[#allocation16_spill] sm:$0xff] %v3185_v21  ;;  %v3204_v7 = vand.u32 4294901760, %v3173_v20  ;;  %468 = vmatpush1.msra.mxu1 %v467_v58  ;;  %293 = vmatprep.subr.mxu0 %v3125_v60  ;;  %v479_v27 = vand.u32 4294901760, %v478_v62  ;;  %v490_v55 = vsub.f32 %v3168_v48, %v4922_v63  ;;  %v3215_v54 = vsub.f32 %v3052_v28, %v3085_v41 }
  0x2f   : > { %v4927_v53 = vand.u32 4294901760, %v3194_v6  ;;  %474 = vmatprep.subr.mxu1 %v473_v26  ;;  %295 = vmatpush1.msra.mxu0 %v3137_v1  ;;  %v485_v44 = vand.u32 4294901760, %v484_v14  ;;  %v496_v58 = vsub.f32 %v3182_v57, %v4924_v19  ;;  %v3224_v62 = vand.u32 4294901760, %v3196_v38 }
  0x30   : > { %5258 = vst [vmem:[#allocation17_spill] sm:$0xff] %v3204_v7  ;;  %v3228_v63 = vsub.f32 %v3074_v37, %v3106_v50  ;;  %480 = vmatpush1.msra.mxu1 %v479_v27  ;;  %297 = vmatprep.subr.mxu0 %v3148_v12  ;;  %v491_v28 = vand.u32 4294901760, %v490_v55  ;;  %v4931_v14 = vand.u32 4294901760, %v3215_v54  ;;  %v3238_v19 = vand.u32 4294901760, %v3206_v47 }
  0x31   : > { %5259 = vst [vmem:[#allocation18_spill] sm:$0xff] %v3224_v62  ;;  %v502_v26 = vsub.f32 %v3194_v6, %v4927_v53  ;;  %486 = vmatprep.subr.mxu1 %v485_v44  ;;  %299 = vmatpush1.msra.mxu0 %v3159_v43  ;;  %v497_v37 = vand.u32 4294901760, %v496_v58  ;;  %v3246_v55 = vsub.f32 %v3098_v46, %v3125_v60  ;;  %v3249_v33 = vand.u32 4294901760, %v3217_v49  ;;  %v3251_v53 = vld [vmem:[#allocation2 + $0x18] sm:$0xff] }
  0x32   : > { %5260 = vst [vmem:[#allocation19_spill] sm:$0xff] %v3238_v19  ;;  %v4934_v27 = vand.u32 4294901760, %v3228_v63  ;;  %492 = vmatpush1.msra.mxu1 %v491_v28  ;;  %301 = vmatprep.subr.mxu0 %v3171_v52  ;;  %v508_v44 = vsub.f32 %v3215_v54, %v4931_v14  ;;  %v3259_v58 = vsub.f32 %v3108_v51, %v3137_v1  ;;  %v3262_v46 = vand.u32 4294901760, %v3230_v39  ;;  %v3276_v51 = vld [vmem:[#allocation2 + $0x10] sm:$0xff] }
  0x33   : > { %5261 = vst [vmem:[#allocation20_spill] sm:$0xff] %v3249_v33  ;;  %v503_v29 = vand.u32 4294901760, %v502_v26  ;;  %498 = vmatprep.subr.mxu1 %v497_v37  ;;  %303 = vmatpush1.msra.mxu0 %v3185_v21  ;;  %v3271_v60 = vsub.f32 %v3115_v56, %v3148_v12  ;;  %v3274_v14 = vand.u32 4294901760, %v3240_v34  ;;  %v3285_v26 = vand.u32 4294901760, %v3251_v53  ;;  %v3287_v56 = vld [vmem:[#allocation2 + $0x8] sm:$0xff] }
  0x34   : > { %5262 = vst [vmem:[#allocation21_spill] sm:$0xff] %v3262_v46  ;;  %v514_v28 = vsub.f32 %v3228_v63, %v4934_v27  ;;  %305 = vmatprep.subr.mxu0 %v3204_v7  ;;  %v509_v37 = vand.u32 4294901760, %v508_v44  ;;  %v3282_v27 = vsub.f32 %v3127_v61, %v3159_v43  ;;  %v5266_v50 = vand.u32 4294901760, %v3246_v55  ;;  %v3310_v44 = vld [vmem:[#allocation2] sm:$0xff] }
  0x35   : > { %5263 = vst [vmem:[#allocation22_spill] sm:$0xff] %v3274_v14  ;;  %504 = vmatpush1.msra.mxu1 %v503_v29  ;;  %5265 = vst [vmem:[#allocation24_spill] sm:$0xff] %v3285_v26  ;;  %307 = vmatpush1.msra.mxu0 %v3224_v62  ;;  %v3296_v1 = vsub.f32 %v3139_v2, %v3171_v52  ;;  %v5268_v61 = vand.u32 4294901760, %v3259_v58  ;;  %v3318_v41 = vand.u32 4294901760, %v3287_v56  ;;  %v3338_v24 = vand.u32 4294901760, %v3310_v44 }
  0x36   : > { %5264 = vst [vmem:[#allocation23_spill] sm:$0xff] %v3282_v27  ;;  %v515_v12 = vand.u32 4294901760, %v514_v28  ;;  %v520_v29 = vsub.f32 %v3246_v55, %v5266_v50  ;;  %510 = vmatprep.subr.mxu1 %v509_v37  ;;  %309 = vmatprep.subr.mxu0 %v3238_v19  ;;  %v3304_v28 = vand.u32 4294901760, %v3276_v51  ;;  %v3308_v50 = vsub.f32 %v3150_v13, %v3185_v21 }
  0x37   : > { %5267 = vst [vmem:[#allocation25_spill] sm:$0xff] %v3296_v1  ;;  %v526_v43 = vsub.f32 %v3259_v58, %v5268_v61  ;;  %311 = vmatpush1.msra.mxu0 %v3249_v33  ;;  %v5271_v37 = vand.u32 4294901760, %v3271_v60  ;;  %5272 = vst [vmem:[#allocation28_spill] sm:$0xff] %v3318_v41  ;;  %v5273_v13 = vand.u32 4294901760, %v3282_v27  ;;  %v3329_v21 = vsub.f32 %v3173_v20, %v3204_v7 }
  0x38   : > { %5269 = vst [vmem:[#allocation26_spill] sm:$0xff] %v3304_v28  ;;  %5270 = vst [vmem:[#allocation27_spill] sm:$0xff] %v3308_v50  ;;  %516 = vmatpush1.msra.mxu1 %v515_v12  ;;  %v521_v2 = vand.u32 4294901760, %v520_v29  ;;  %313 = vmatprep.subr.mxu0 %v3262_v46  ;;  %v3344_v29 = vld [vmem:[#allocation2 + $0x1e8] sm:$0xff] }
  0x39   : > { %v532_v52 = vsub.f32 %v3271_v60, %v5271_v37  ;;  %v527_v32 = vand.u32 4294901760, %v526_v43  ;;  %v538_v12 = vsub.f32 %v3282_v27, %v5273_v13  ;;  %5274 = vst [vmem:[#allocation29_spill] sm:$0xff] %v3329_v21  ;;  %v3331_v37 = vld [vmem:[#allocation2 + $0x1f0] sm:$0xff]  ;;  %315 = vmatpush1.msra.mxu0 %v3274_v14  ;;  %v5275_v43 = vand.u32 4294901760, %v3296_v1  ;;  %5276 = vst [vmem:[#allocation30_spill] sm:$0xff] %v3338_v24 }
  0x3a   : > { %522 = vmatprep.subr.mxu1 %v521_v2  ;;  %v3342_v13 = vsub.f32 %v3196_v38, %v3224_v62  ;;  %317 = vmatprep.subr.mxu0 %v3285_v26  ;;  %v3363_v62 = vand.u32 4294901760, %v3331_v37 }
  0x3b   : > { %v533_v61 = vand.u32 4294901760, %v532_v52  ;;  %v544_v30 = vsub.f32 %v3296_v1, %v5275_v43  ;;  %528 = vmatpush1.msra.mxu1 %v527_v32  ;;  %v539_v20 = vand.u32 4294901760, %v538_v12  ;;  %v5278_v52 = vand.u32 4294901760, %v3308_v50  ;;  %v3354_v1 = vld [vmem:[#allocation2 + $0x1e0] sm:$0xff]  ;;  %319 = vmatpush1.msra.mxu0 %v3304_v28 }
  0x3c   : > { %5277 = vst [vmem:[#allocation31_spill] sm:$0xff] %v3342_v13  ;;  %v3352_v43 = vand.u32 4294901760, %v3320_v36  ;;  %v3360_v12 = vsub.f32 %v3206_v47, %v3238_v19  ;;  %5281 = vst [vmem:[#allocation34_spill] sm:$0xff] %v3363_v62  ;;  %321 = vmatprep.subr.mxu0 %v3318_v41  ;;  %v3373_v32 = vsub.f32 %v3217_v49, %v3249_v33  ;;  %v3376_v47 = vand.u32 4294901760, %v3344_v29  ;;  %v3390_v49 = vld [vmem:[#allocation2 + $0x1d0] sm:$0xff] }
  0x3d   : > { %v550_v2 = vsub.f32 %v3308_v50, %v5278_v52  ;;  %534 = vmatprep.subr.mxu1 %v533_v61  ;;  %v545_v38 = vand.u32 4294901760, %v544_v30  ;;  %v3365_v52 = vld [vmem:[#allocation2 + $0x1d8] sm:$0xff]  ;;  %v5282_v61 = vand.u32 4294901760, %v3329_v21  ;;  %323 = vmatpush1.msra.mxu0 %v3338_v24  ;;  %v5285_v19 = vand.u32 4294901760, %v3342_v13 }
  0x3e   : > { %5279 = vst [vmem:[#allocation32_spill] sm:$0xff] %v3352_v43  ;;  %5280 = vst [vmem:[#allocation33_spill] sm:$0xff] %v3360_v12  ;;  %540 = vmatpush1.msra.mxu1 %v539_v20  ;;  %v3385_v50 = vsub.f32 %v3230_v39, %v3262_v46  ;;  %325 = vmatprep.subr.mxu0 %v3352_v43  ;;  %v3401_v39 = vld [vmem:[#allocation2 + $0x1c8] sm:$0xff] }
  0x3f   : > { %v551_v7 = vand.u32 4294901760, %v550_v2  ;;  %v556_v30 = vsub.f32 %v3329_v21, %v5282_v61  ;;  %5283 = vst [vmem:[#allocation35_spill] sm:$0xff] %v3373_v32  ;;  %5284 = vst [vmem:[#allocation36_spill] sm:$0xff] %v3376_v47  ;;  %546 = vmatprep.subr.mxu1 %v545_v38  ;;  %v562_v20 = vsub.f32 %v3342_v13, %v5285_v19  ;;  %v3388_v61 = vand.u32 4294901760, %v3354_v1 }
  0x40   : > { %5286 = vst [vmem:[#allocation37_spill] sm:$0xff] %v3385_v50  ;;  %v4977_v38 = vand.u32 4294901760, %v3373_v32  ;;  %v3396_v19 = vsub.f32 %v3240_v34, %v3274_v14  ;;  %v3399_v2 = vand.u32 4294901760, %v3365_v52  ;;  %v5290_v13 = vand.u32 4294901760, %v3360_v12  ;;  %327 = vmatpush2.msra.mxu0 %v3363_v62 }
  0x41   : > { %5287 = vst [vmem:[#allocation38_spill] sm:$0xff] %v3388_v61  ;;  %552 = vmatpush1.msra.mxu1 %v551_v7  ;;  %v557_v33 = vand.u32 4294901760, %v556_v30  ;;  %v563_v46 = vand.u32 4294901760, %v562_v20  ;;  %v3410_v30 = vsub.f32 %v3251_v53, %v3285_v26  ;;  %329 = vmatprep.subr.mxu0 %v3376_v47  ;;  %v3418_v14 = vand.u32 4294901760, %v3390_v49  ;;  %v3424_v7 = vld [vmem:[#allocation2 + $0x1c0] sm:$0xff] }
  0x42   : > { %5288 = vst [vmem:[#allocation39_spill] sm:$0xff] %v3396_v19  ;;  %5289 = vst [vmem:[#allocation40_spill] sm:$0xff] %v3399_v2  ;;  %v568_v21 = vsub.f32 %v3360_v12, %v5290_v13  ;;  %v574_v34 = vsub.f32 %v3373_v32, %v4977_v38  ;;  %v3422_v13 = vsub.f32 %v3276_v51, %v3304_v28  ;;  %331 = vmatpush2.msra.mxu0 %v3388_v61  ;;  %v3434_v32 = vld [vmem:[#allocation2 + $0x1b8] sm:$0xff] }
  0x43   : > { %5291 = vst [vmem:[#allocation41_spill] sm:$0xff] %v3410_v30  ;;  %558 = vmatprep.subr.mxu1 %v557_v33  ;;  %5292 = vst [vmem:[#allocation42_spill] sm:$0xff] %v3418_v14  ;;  %v5294_v33 = vand.u32 4294901760, %v3385_v50  ;;  %v3432_v20 = vand.u32 4294901760, %v3401_v39  ;;  %v5296_v51 = vand.u32 4294901760, %v3396_v19  ;;  %333 = vmatprep.subr.mxu0 %v3399_v2 }
  0x44   : > { %5293 = vst [vmem:[#allocation43_spill] sm:$0xff] %v3422_v13  ;;  %564 = vmatpush1.msra.mxu1 %v563_v46  ;;  %v569_v53 = vand.u32 4294901760, %v568_v21  ;;  %v575_v12 = vand.u32 4294901760, %v574_v34  ;;  %v3443_v46 = vsub.f32 %v3287_v56, %v3318_v41  ;;  %335 = vmatpush2.msra.mxu0 %v3418_v14  ;;  %v3456_v21 = vsub.f32 %v3310_v44, %v3338_v24  ;;  %v3479_v24 = vld [vmem:[#allocation2 + $0x198] sm:$0xff] }
  0x45   : > { %v580_v26 = vsub.f32 %v3385_v50, %v5294_v33  ;;  %5295 = vst [vmem:[#allocation44_spill] sm:$0xff] %v3432_v20  ;;  %v586_v28 = vsub.f32 %v3396_v19, %v5296_v51  ;;  %v3445_v33 = vld [vmem:[#allocation2 + $0x1b0] sm:$0xff]  ;;  %v5298_v50 = vand.u32 4294901760, %v3410_v30  ;;  %v3452_v51 = vand.u32 4294901760, %v3424_v7  ;;  %v3458_v19 = vld [vmem:[#allocation2 + $0x1a8] sm:$0xff]  ;;  %337 = vmatprep.subr.mxu0 %v3432_v20 }
  0x46   : > { %5297 = vst [vmem:[#allocation45_spill] sm:$0xff] %v3443_v46  ;;  %570 = vmatprep.subr.mxu1 %v569_v53  ;;  %5300 = vst [vmem:[#allocation47_spill] sm:$0xff] %v3456_v21  ;;  %v5301_v53 = vand.u32 4294901760, %v3422_v13  ;;  %v3466_v41 = vand.u32 4294901760, %v3434_v32 }
  0x47   : > { %v581_v38 = vand.u32 4294901760, %v580_v26  ;;  %v592_v34 = vsub.f32 %v3410_v30, %v5298_v50  ;;  %5299 = vst [vmem:[#allocation46_spill] sm:$0xff] %v3452_v51  ;;  %576 = vmatpush1.msra.mxu1 %v575_v12  ;;  %v587_v56 = vand.u32 4294901760, %v586_v28  ;;  %v3468_v30 = vld [vmem:[#allocation2 + $0x1a0] sm:$0xff]  ;;  %339 = vmatpush2.msra.mxu0 %v3452_v51  ;;  %v5000_v12 = vand.u32 4294901760, %v3456_v21 }
  0x48   : > { %v598_v26 = vsub.f32 %v3422_v13, %v5301_v53  ;;  %5302 = vst [vmem:[#allocation48_spill] sm:$0xff] %v3466_v41  ;;  %v3474_v28 = vsub.f32 %v3320_v36, %v3352_v43  ;;  %v3477_v53 = vand.u32 4294901760, %v3445_v33  ;;  %v5305_v13 = vand.u32 4294901760, %v3443_v46  ;;  %341 = vmatprep.subr.mxu0 %v3466_v41 }
  0x49   : > { %582 = vmatprep.subr.mxu1 %v581_v38  ;;  %v593_v44 = vand.u32 4294901760, %v592_v34  ;;  %v3487_v34 = vsub.f32 %v3331_v37, %v3363_v62  ;;  %v3490_v36 = vand.u32 4294901760, %v3458_v19  ;;  %v610_v43 = vsub.f32 %v3456_v21, %v5000_v12  ;;  %v3504_v37 = vld [vmem:[#allocation2 + $0x190] sm:$0xff] }
  0x4a   : > { %5303 = vst [vmem:[#allocation49_spill] sm:$0xff] %v3474_v28  ;;  %5304 = vst [vmem:[#allocation50_spill] sm:$0xff] %v3477_v53  ;;  %588 = vmatpush1.msra.mxu1 %v587_v56  ;;  %v599_v50 = vand.u32 4294901760, %v598_v26  ;;  %v604_v38 = vsub.f32 %v3443_v46, %v5305_v13  ;;  %343 = vmatpush2.msra.mxu0 %v3477_v53  ;;  %v3499_v13 = vsub.f32 %v3344_v29, %v3376_v47  ;;  %v3515_v29 = vld [vmem:[#allocation2 + $0x188] sm:$0xff] }
  0x4b   : > { %5306 = vst [vmem:[#allocation51_spill] sm:$0xff] %v3487_v34  ;;  %5307 = vst [vmem:[#allocation52_spill] sm:$0xff] %v3490_v36  ;;  %594 = vmatprep.subr.mxu1 %v593_v44  ;;  %v3502_v26 = vand.u32 4294901760, %v3468_v30  ;;  %v5011_v44 = vand.u32 4294901760, %v3487_v34  ;;  %345 = vmatprep.subr.mxu0 %v3490_v36  ;;  %v3510_v12 = vsub.f32 %v3354_v1, %v3388_v61  ;;  %v3513_v56 = vand.u32 4294901760, %v3479_v24 }
  0x4c   : > { %5308 = vst [vmem:[#allocation53_spill] sm:$0xff] %v3499_v13  ;;  %600 = vmatpush1.msra.mxu1 %v599_v50  ;;  %v605_v62 = vand.u32 4294901760, %v604_v38  ;;  %v611_v47 = vand.u32 4294901760, %v610_v43  ;;  %v5312_v21 = vand.u32 4294901760, %v3474_v28  ;;  %v3524_v38 = vsub.f32 %v3365_v52, %v3399_v2  ;;  %v3538_v50 = vld [vmem:[#allocation2 + $0x180] sm:$0xff] }
  0x4d   : > { %5309 = vst [vmem:[#allocation54_spill] sm:$0xff] %v3502_v26  ;;  %5310 = vst [vmem:[#allocation55_spill] sm:$0xff] %v3510_v12  ;;  %347 = vmatpush2.msra.mxu0 %v3502_v26  ;;  %v622_v1 = vsub.f32 %v3487_v34, %v5011_v44  ;;  %v3532_v43 = vand.u32 4294901760, %v3504_v37  ;;  %v3545_v61 = vand.u32 4294901760, %v3515_v29  ;;  %v3547_v34 = vld [vmem:[#allocation2 + $0x178] sm:$0xff]  ;;  %v5318_v27 = vand.u32 4294901760, %v3510_v12 }
  0x4e   : > { %5311 = vst [vmem:[#allocation56_spill] sm:$0xff] %v3513_v56  ;;  %v616_v46 = vsub.f32 %v3474_v28, %v5312_v21  ;;  %5313 = vst [vmem:[#allocation57_spill] sm:$0xff] %v3524_v38  ;;  %606 = vmatprep.subr.mxu1 %v605_v62  ;;  %349 = vmatprep.subr.mxu0 %v3513_v56  ;;  %v3536_v21 = vsub.f32 %v3390_v49, %v3418_v14  ;;  %v5316_v62 = vand.u32 4294901760, %v3499_v13 }
  0x4f   : > { %5314 = vst [vmem:[#allocation58_spill] sm:$0xff] %v3532_v43  ;;  %612 = vmatpush1.msra.mxu1 %v611_v47  ;;  %5317 = vst [vmem:[#allocation60_spill] sm:$0xff] %v3545_v61  ;;  %v623_v28 = vand.u32 4294901760, %v622_v1  ;;  %v634_v49 = vsub.f32 %v3510_v12, %v5318_v27  ;;  %351 = vmatpush2.msra.mxu0 %v3532_v43  ;;  %v5320_v14 = vand.u32 4294901760, %v3524_v38  ;;  %v3565_v27 = vand.u32 4294901760, %v3538_v50  ;;  %v3571_v12 = vld [vmem:[#allocation2 + $0x168] sm:$0xff] }
  0x50   : > { %5315 = vst [vmem:[#allocation59_spill] sm:$0xff] %v3536_v21  ;;  %v617_v52 = vand.u32 4294901760, %v616_v46  ;;  %v628_v2 = vsub.f32 %v3499_v13, %v5316_v62  ;;  %v3556_v46 = vsub.f32 %v3401_v39, %v3432_v20  ;;  %v3558_v62 = vld [vmem:[#allocation2 + $0x170] sm:$0xff]  ;;  %353 = vmatprep.subr.mxu0 %v3545_v61  ;;  %v3569_v47 = vsub.f32 %v3424_v7, %v3452_v51  ;;  %v3595_v20 = vld [vmem:[#allocation2 + $0x158] sm:$0xff] }
  0x51   : > { %v640_v1 = vsub.f32 %v3524_v38, %v5320_v14  ;;  %5321 = vst [vmem:[#allocation62_spill] sm:$0xff] %v3565_v27  ;;  %v635_v39 = vand.u32 4294901760, %v634_v49  ;;  %v3578_v14 = vand.u32 4294901760, %v3547_v34  ;;  %v3580_v38 = vld [vmem:[#allocation2 + $0x160] sm:$0xff]  ;;  %355 = vmatpush2.msra.mxu0 %v3565_v27  ;;  %v3590_v49 = vsub.f32 %v3434_v32, %v3466_v41 }
  0x52   : > { %5319 = vst [vmem:[#allocation61_spill] sm:$0xff] %v3556_v46  ;;  %618 = vmatprep.subr.mxu1 %v617_v52  ;;  %v629_v44 = vand.u32 4294901760, %v628_v2  ;;  %5322 = vst [vmem:[#allocation63_spill] sm:$0xff] %v3569_v47  ;;  %v5323_v52 = vand.u32 4294901760, %v3536_v21  ;;  %v3606_v32 = vand.u32 4294901760, %v3571_v12 }
  0x53   : > { %624 = vmatpush2.msra.mxu1 %v623_v28  ;;  %5324 = vst [vmem:[#allocation64_spill] sm:$0xff] %v3578_v14  ;;  %v641_v7 = vand.u32 4294901760, %v640_v1  ;;  %v5034_v28 = vand.u32 4294901760, %v3569_v47  ;;  %5325 = vst [vmem:[#allocation65_spill] sm:$0xff] %v3590_v49  ;;  %357 = vmatprep.subr.mxu0 %v3578_v14  ;;  %v3603_v1 = vsub.f32 %v3445_v33, %v3477_v53  ;;  %v3620_v33 = vld [vmem:[#allocation2 + $0x150] sm:$0xff] }
  0x54   : > { %v646_v2 = vsub.f32 %v3536_v21, %v5323_v52  ;;  %630 = vmatprep.subr.mxu1 %v629_v44  ;;  %v3593_v52 = vand.u32 4294901760, %v3558_v62  ;;  %v5327_v21 = vand.u32 4294901760, %v3556_v46  ;;  %5329 = vst [vmem:[#allocation68_spill] sm:$0xff] %v3606_v32 }
  0x55   : > { %636 = vmatpush2.msra.mxu1 %v635_v39  ;;  %5328 = vst [vmem:[#allocation67_spill] sm:$0xff] %v3603_v1  ;;  %v658_v41 = vsub.f32 %v3569_v47, %v5034_v28  ;;  %v5045_v53 = vand.u32 4294901760, %v3603_v1  ;;  %v3627_v28 = vsub.f32 %v3468_v30, %v3502_v26  ;;  %v3630_v39 = vand.u32 4294901760, %v3595_v20  ;;  %v3655_v26 = vld [vmem:[#allocation2 + $0x140] sm:$0xff] }
  0x56   : > { %5326 = vst [vmem:[#allocation66_spill] sm:$0xff] %v3593_v52  ;;  %v647_v51 = vand.u32 4294901760, %v646_v2  ;;  %v652_v44 = vsub.f32 %v3556_v46, %v5327_v21  ;;  %642 = vmatprep.subr.mxu1 %v641_v7  ;;  %359 = vmatpush2.msra.mxu0 %v3593_v52  ;;  %v3615_v21 = vsub.f32 %v3458_v19, %v3490_v36  ;;  %v3618_v2 = vand.u32 4294901760, %v3580_v38  ;;  %v3632_v19 = vld [vmem:[#allocation2 + $0x148] sm:$0xff] }
  0x57   : > { %361 = vmatprep.subr.mxu0 %v3606_v32  ;;  %5332 = vst [vmem:[#allocation71_spill] sm:$0xff] %v3627_v28  ;;  %5333 = vst [vmem:[#allocation72_spill] sm:$0xff] %v3630_v39  ;;  %v659_v36 = vand.u32 4294901760, %v658_v41  ;;  %v5334_v47 = vand.u32 4294901760, %v3590_v49  ;;  %v3641_v30 = vsub.f32 %v3479_v24, %v3513_v56  ;;  %v3662_v41 = vand.u32 4294901760, %v3632_v19 }
  0x58   : > { %5330 = vst [vmem:[#allocation69_spill] sm:$0xff] %v3615_v21  ;;  %5331 = vst [vmem:[#allocation70_spill] sm:$0xff] %v3618_v2  ;;  %648 = vmatpush2.msra.mxu1 %v647_v51  ;;  %v653_v7 = vand.u32 4294901760, %v652_v44  ;;  %363 = vmatpush2.msra.mxu0 %v3618_v2  ;;  %v670_v44 = vsub.f32 %v3603_v1, %v5045_v53  ;;  %v3653_v51 = vsub.f32 %v3504_v37, %v3532_v43  ;;  %v3664_v1 = vld [vmem:[#allocation2 + $0x138] sm:$0xff]  ;;  %v3680_v53 = vld [vmem:[#allocation2 + $0x130] sm:$0xff] }
  0x59   : > { %v664_v46 = vsub.f32 %v3590_v49, %v5334_v47  ;;  %5335 = vst [vmem:[#allocation73_spill] sm:$0xff] %v3641_v30  ;;  %365 = vmatprep.subr.mxu0 %v3630_v39  ;;  %v3649_v47 = vand.u32 4294901760, %v3620_v33  ;;  %5339 = vst [vmem:[#allocation76_spill] sm:$0xff] %v3662_v41  ;;  %v5340_v43 = vand.u32 4294901760, %v3627_v28  ;;  %v5342_v49 = vand.u32 4294901760, %v3641_v30 }
  0x5a   : > { %654 = vmatprep.subr.mxu1 %v653_v7  ;;  %5337 = vst [vmem:[#allocation75_spill] sm:$0xff] %v3653_v51  ;;  %v5338_v7 = vand.u32 4294901760, %v3615_v21  ;;  %v671_v37 = vand.u32 4294901760, %v670_v44 }
  0x5b   : > { %5336 = vst [vmem:[#allocation74_spill] sm:$0xff] %v3649_v47  ;;  %660 = vmatpush2.msra.mxu1 %v659_v36  ;;  %v665_v24 = vand.u32 4294901760, %v664_v46  ;;  %v682_v36 = vsub.f32 %v3627_v28, %v5340_v43  ;;  %367 = vmatpush2.msra.mxu0 %v3649_v47  ;;  %v688_v44 = vsub.f32 %v3641_v30, %v5342_v49  ;;  %v3687_v43 = vand.u32 4294901760, %v3655_v26  ;;  %v3702_v28 = vld [vmem:[#allocation2 + $0x120] sm:$0xff] }
  0x5c   : > { %v676_v56 = vsub.f32 %v3615_v21, %v5338_v7  ;;  %v3678_v7 = vsub.f32 %v3515_v29, %v3545_v61  ;;  %369 = vmatprep.subr.mxu0 %v3662_v41  ;;  %v3691_v46 = vsub.f32 %v3538_v50, %v3565_v27  ;;  %v3693_v29 = vld [vmem:[#allocation2 + $0x128] sm:$0xff]  ;;  %v3700_v30 = vand.u32 4294901760, %v3664_v1 }
  0x5d   : > { %666 = vmatprep.subr.mxu1 %v665_v24  ;;  %5343 = vst [vmem:[#allocation78_spill] sm:$0xff] %v3687_v43  ;;  %v683_v61 = vand.u32 4294901760, %v682_v36  ;;  %v689_v13 = vand.u32 4294901760, %v688_v44  ;;  %371 = vmatpush2.msra.mxu0 %v3687_v43  ;;  %v3711_v36 = vand.u32 4294901760, %v3680_v53  ;;  %v3722_v44 = vsub.f32 %v3558_v62, %v3593_v52  ;;  %v3739_v62 = vld [vmem:[#allocation2 + $0x110] sm:$0xff] }
  0x5e   : > { %5341 = vst [vmem:[#allocation77_spill] sm:$0xff] %v3678_v7  ;;  %v677_v21 = vand.u32 4294901760, %v676_v56  ;;  %5344 = vst [vmem:[#allocation79_spill] sm:$0xff] %v3691_v46  ;;  %672 = vmatpush2.msra.mxu1 %v671_v37  ;;  %v5345_v56 = vand.u32 4294901760, %v3653_v51  ;;  %v5068_v50 = vand.u32 4294901760, %v3691_v46  ;;  %v3708_v37 = vsub.f32 %v3547_v34, %v3578_v14  ;;  %373 = vmatprep.subr.mxu0 %v3700_v30 }
  0x5f   : > { %5346 = vst [vmem:[#allocation80_spill] sm:$0xff] %v3700_v30  ;;  %v5348_v27 = vand.u32 4294901760, %v3678_v7  ;;  %5349 = vst [vmem:[#allocation82_spill] sm:$0xff] %v3722_v44  ;;  %v3725_v34 = vand.u32 4294901760, %v3693_v29  ;;  %375 = vmatpush2.msra.mxu0 %v3711_v36 }
  0x60   : > { %v694_v24 = vsub.f32 %v3653_v51, %v5345_v56  ;;  %678 = vmatprep.subr.mxu1 %v677_v21  ;;  %5347 = vst [vmem:[#allocation81_spill] sm:$0xff] %v3708_v37  ;;  %v3713_v56 = vld [vmem:[#allocation2 + $0x118] sm:$0xff]  ;;  %v706_v14 = vsub.f32 %v3691_v46, %v5068_v50  ;;  %v3745_v50 = vsub.f32 %v3580_v38, %v3618_v2  ;;  %v5357_v2 = vand.u32 4294901760, %v3722_v44 }
  0x61   : > { %684 = vmatpush2.msra.mxu1 %v683_v61  ;;  %v700_v21 = vsub.f32 %v3678_v7, %v5348_v27  ;;  %5350 = vst [vmem:[#allocation83_spill] sm:$0xff] %v3725_v34  ;;  %v3734_v27 = vsub.f32 %v3571_v12, %v3606_v32  ;;  %377 = vmatprep.subr.mxu0 %v3725_v34  ;;  %v3748_v61 = vand.u32 4294901760, %v3713_v56  ;;  %v3750_v12 = vld [vmem:[#allocation2 + $0x108] sm:$0xff] }
  0x62   : > { %v695_v49 = vand.u32 4294901760, %v694_v24  ;;  %690 = vmatprep.subr.mxu1 %v689_v13  ;;  %v3737_v24 = vand.u32 4294901760, %v3702_v28  ;;  %5353 = vst [vmem:[#allocation86_spill] sm:$0xff] %v3745_v50  ;;  %v3764_v38 = vsub.f32 %v3595_v20, %v3630_v39  ;;  %v718_v46 = vsub.f32 %v3722_v44, %v5357_v2  ;;  %v193_v44 = vld [vmem:[%s3755_s27 + $0x8] sm:$0xff] }
  0x63   : > { %5351 = vst [vmem:[#allocation84_spill] sm:$0xff] %v3734_v27  ;;  %v701_v52 = vand.u32 4294901760, %v700_v21  ;;  %5354 = vst [vmem:[#allocation87_spill] sm:$0xff] %v3748_v61  ;;  %v5355_v21 = vand.u32 4294901760, %v3708_v37  ;;  %v3776_v32 = vsub.f32 %v3620_v33, %v3649_v47  ;;  %v3785_v39 = vand.u32 4294901760, %v3750_v12 }
  0x64   : > { %5352 = vst [vmem:[#allocation85_spill] sm:$0xff] %v3737_v24  ;;  %696 = vmatpush2.msra.mxu1 %v695_v49  ;;  %v707_v49 = vand.u32 4294901760, %v706_v14  ;;  %379 = vmatpush2.msra.mxu0 %v3737_v24  ;;  %5356 = vst [vmem:[#allocation88_spill] sm:$0xff] %v3764_v38  ;;  %v719_v7 = vand.u32 4294901760, %v718_v46  ;;  %v5360_v51 = vand.u32 4294901760, %v3745_v50  ;;  %v5361_v47 = vand.u32 4294901760, %v3764_v38 }
  0x65   : > { %v712_v13 = vsub.f32 %v3708_v37, %v5355_v21  ;;  %702 = vmatprep.subr.mxu1 %v701_v52  ;;  %381 = vmatprep.subr.mxu0 %v3748_v61  ;;  %v3772_v21 = vand.u32 4294901760, %v3739_v62  ;;  %5358 = vst [vmem:[#allocation89_spill] sm:$0xff] %v3776_v32  ;;  %v3778_v37 = vld [vmem:[#allocation2 + $0x100] sm:$0xff]  ;;  %v5359_v52 = vand.u32 4294901760, %v3734_v27 }
  0x66   : > { %708 = vmatpush2.msra.mxu1 %v707_v49  ;;  %v730_v33 = vsub.f32 %v3745_v50, %v5360_v51  ;;  %v3803_v46 = vand.u32 4294901760, %v3778_v37  ;;  %v3807_v51 = vsub.f32 %v3655_v26, %v3687_v43  ;;  %v3819_v26 = vsub.f32 %v3664_v1, %v3700_v30 }
  0x67   : > { %v713_v20 = vand.u32 4294901760, %v712_v13  ;;  %v724_v2 = vsub.f32 %v3734_v27, %v5359_v52  ;;  %383 = vmatpush2.msra.mxu0 %v3772_v21  ;;  %v3795_v13 = vsub.f32 %v3632_v19, %v3662_v41  ;;  %v192_v52 = vld [vmem:[%s3755_s27] sm:$0xff]  ;;  %v736_v27 = vsub.f32 %v3764_v38, %v5361_v47 }
  0x68   : > { %385 = vmatprep.subr.mxu0 %v3785_v39  ;;  %5362 = vst [vmem:[#allocation90_spill] sm:$0xff] %v3807_v51  ;;  %v731_v49 = vand.u32 4294901760, %v730_v33  ;;  %v5363_v19 = vand.u32 4294901760, %v3776_v32  ;;  %v3813_v41 = vand.u32 4294901760, %v193_v44  ;;  %v5095_v38 = vand.u32 4294901760, %v3807_v51 }
  0x69   : > { %714 = vmatprep.subr.mxu1 %v713_v20  ;;  %v725_v14 = vand.u32 4294901760, %v724_v2  ;;  %v5096_v2 = vand.u32 4294901760, %v3795_v13  ;;  %v737_v47 = vand.u32 4294901760, %v736_v27  ;;  %387 = vmatpush2.msra.mxu0 %v3803_v46  ;;  %v3832_v27 = vsub.f32 %v3680_v53, %v3711_v36 }
  0x6a   : > { %720 = vmatpush2.msra.mxu1 %v719_v7  ;;  %v742_v20 = vsub.f32 %v3776_v32, %v5363_v19  ;;  %5364 = vst [vmem:[#allocation91_spill] sm:$0xff] %v3813_v41  ;;  %v3821_v7 = vand.u32 4294901760, %v192_v52  ;;  %v3827_v43 = vsub.f32 %v193_v44, %v3813_v41  ;;  %824 = vmatprep.subr.mxu0 %v3027_v18 }
  0x6b   : > { %726 = vmatprep.subr.mxu1 %v725_v14  ;;  %v748_v19 = vsub.f32 %v3795_v13, %v5096_v2  ;;  %5366 = vst [vmem:[#allocation93_spill] sm:$0xff] %v3832_v27  ;;  %v754_v1 = vsub.f32 %v3807_v51, %v5095_v38  ;;  %v5099_v14 = vand.u32 4294901760, %v3819_v26  ;;  %v3843_v44 = vsub.f32 %v3693_v29, %v3725_v34 }
  0x6c   : > { %5365 = vst [vmem:[#allocation92_spill] sm:$0xff] %v3821_v7  ;;  %732 = vmatpush2.msra.mxu1 %v731_v49  ;;  %v743_v33 = vand.u32 4294901760, %v742_v20  ;;  %v3839_v49 = vsub.f32 %v192_v52, %v3821_v7  ;;  %806 = vmatprep.mubr.f32.mxu1 %v3813_v41  ;;  %v5100_v53 = vand.u32 4294901760, %v3827_v43  ;;  %v3850_v38 = vsub.f32 %v3702_v28, %v3737_v24 }
  0x6d   : > { %738 = vmatprep.subr.mxu1 %v737_v47  ;;  %v749_v20 = vand.u32 4294901760, %v748_v19  ;;  %v5103_v47 = vand.u32 4294901760, %v3832_v27  ;;  %v755_v2 = vand.u32 4294901760, %v754_v1  ;;  %v760_v52 = vsub.f32 %v3819_v26, %v5099_v14 }
  0x6e   : > { %744 = vmatpush2.msra.mxu1 %v743_v33  ;;  %v5108_v29 = vand.u32 4294901760, %v3839_v49  ;;  %v5109_v34 = vand.u32 4294901760, %v3843_v44  ;;  %v391_v33 = vsub.f32 %v3827_v43, %v5100_v53  ;;  %v3866_v1 = vsub.f32 %v3713_v56, %v3748_v61 }
  0x6f   : > { %750 = vmatprep.subr.mxu1 %v749_v20  ;;  %v766_v19 = vsub.f32 %v3832_v27, %v5103_v47  ;;  %v761_v14 = vand.u32 4294901760, %v760_v52  ;;  %v3876_v41 = vsub.f32 %v3739_v62, %v3772_v21  ;;  %v5367_v24 = vand.u32 4294901760, %v3850_v38 }
  0x70   : > { %756 = vmatpush2.msra.mxu1 %v755_v2  ;;  %v397_v20 = vsub.f32 %v3839_v49, %v5108_v29  ;;  %v772_v53 = vsub.f32 %v3843_v44, %v5109_v34  ;;  %v392_v47 = vand.u32 4294901760, %v391_v33  ;;  %v5113_v2 = vand.u32 4294901760, %v3866_v1 }
  0x71   : > { %v767_v28 = vand.u32 4294901760, %v766_v19  ;;  %v778_v56 = vsub.f32 %v3850_v38, %v5367_v24  ;;  %762 = vmatprep.subr.mxu1 %v761_v14  ;;  %v5112_v29 = vand.u32 4294901760, %v3876_v41  ;;  %v3885_v34 = vsub.f32 %v3750_v12, %v3785_v39 }
  0x72   : > { %v398_v52 = vand.u32 4294901760, %v397_v20  ;;  %v773_v61 = vand.u32 4294901760, %v772_v53  ;;  %393 = vmatprep.mubr.f32.mxu0 %v392_v47  ;;  %v784_v33 = vsub.f32 %v3866_v1, %v5113_v2  ;;  %v3892_v24 = vsub.f32 %v3778_v37, %v3803_v46  ;;  %v5384_v2 = vld [vmem:[#allocation12_spill] sm:$0xff] }
  0x73   : > { %5368 = vst [vmem:[#allocation94_spill] sm:$0xff] %v3885_v34  ;;  %768 = vmatpush2.msra.mxu1 %v767_v28  ;;  %v779_v62 = vand.u32 4294901760, %v778_v56  ;;  %v790_v14 = vsub.f32 %v3876_v41, %v5112_v29  ;;  %v5111_v12 = vand.u32 4294901760, %v3885_v34  ;;  %v5370_v56 = vld [vmem:[#allocation5_spill] sm:$0xff]  ;;  %v5383_v29 = vld [vmem:[#allocation35_spill] sm:$0xff] }
  0x74   : > { %5369 = vst [vmem:[#allocation95_spill] sm:$0xff] %v3892_v24  ;;  %399 = vmatmul.mubr.f32.vlgmr.msra.gmra.mxu0 %v398_v52  ;;  %774 = vmatprep.subr.mxu1 %v773_v61  ;;  %v785_v53 = vand.u32 4294901760, %v784_v33  ;;  %v5110_v47 = vand.u32 4294901760, %v3892_v24  ;;  %v5371_v52 = vld [vmem:[#allocation23_spill] sm:$0xff]  ;;  %v5373_v33 = vld [vmem:[#allocation25_spill] sm:$0xff] }
  0x75   : > { %827 = vmatpush1.msra.mxu0 %v3040_v23  ;;  %780 = vmatpush2.msra.mxu1 %v779_v62  ;;  %v791_v19 = vand.u32 4294901760, %v790_v14  ;;  %v796_v37 = vsub.f32 %v3885_v34, %v5111_v12  ;;  %v5372_v62 = vld [vmem:[#allocation6_spill] sm:$0xff]  ;;  %v5374_v14 = vld [vmem:[#allocation7_spill] sm:$0xff] }
  0x76   : > { %830 = vmatprep.subr.mxu0 %v3046_v25  ;;  %786 = vmatprep.subr.mxu1 %v785_v53  ;;  %v802_v61 = vsub.f32 %v3892_v24, %v5110_v47  ;;  %v5375_v53 = vld [vmem:[#allocation27_spill] sm:$0xff]  ;;  %v5381_v47 = vld [vmem:[#allocation33_spill] sm:$0xff] }
  0x77   : > { %833 = vmatpush1.msra.mxu0 %v3060_v31  ;;  %792 = vmatpush2.msra.mxu1 %v791_v19  ;;  %v797_v28 = vand.u32 4294901760, %v796_v37  ;;  %v5376_v19 = vld [vmem:[#allocation8_spill] sm:$0xff]  ;;  %v5377_v37 = vld [vmem:[#allocation29_spill] sm:$0xff]  ;;  %v5382_v12 = vld [vmem:[#allocation11_spill] sm:$0xff] }
  0x78   : > { %836 = vmatprep.subr.mxu0 %v3069_v35  ;;  %v803_v20 = vand.u32 4294901760, %v802_v61  ;;  %v5378_v61 = vld [vmem:[#allocation9_spill] sm:$0xff] }
  0x79   : > { %839 = vmatpush1.msra.mxu0 %v3082_v40  ;;  %798 = vmatprep.subr.mxu1 %v797_v28  ;;  %v5379_v28 = vld [vmem:[#allocation31_spill] sm:$0xff] }
  0x7a   : > { %842 = vmatprep.subr.mxu0 %v3096_v45  ;;  %804 = vmatpush2.msra.mxu1 %v803_v20  ;;  %v5380_v20 = vld [vmem:[#allocation10_spill] sm:$0xff] }
  0x7b   : > { %845 = vmatpush1.msra.mxu0 %v3122_v59  ;;  %808 = vmatmul.mubr.f32.vlgmr.msra.gmra.mxu1 %v3821_v7  ;;  %v5385_v7 = vld [vmem:[#allocation37_spill] sm:$0xff] }
  0x7c   : > { %848 = vmatprep.subr.mxu0 %v3134_v0  ;;  %1036 = vmatprep.subr.mxu1 %v3007_v3 }
  0x7d   : > { %851 = vmatpush1.msra.mxu0 %v3145_v8  ;;  %1038 = vmatpush1.msra.mxu1 %v3009_v4 }
  0x7e   : > { %854 = vmatprep.subr.mxu0 %v3156_v42  ;;  %1040 = vmatprep.subr.mxu1 %v3011_v5 }
  0x7f   : > { %857 = vmatpush1.msra.mxu0 %v3168_v48  ;;  %1042 = vmatpush1.msra.mxu1 %v3013_v9 }
  0x80   : > { %860 = vmatprep.subr.mxu0 %v3182_v57  ;;  %1044 = vmatprep.subr.mxu1 %v3015_v10 }
  0x81   : > { %863 = vmatpush1.msra.mxu0 %v3194_v6  ;;  %1046 = vmatpush1.msra.mxu1 %v3017_v11 }
  0x82   : > { %866 = vmatprep.subr.mxu0 %v3215_v54  ;;  %1048 = vmatprep.subr.mxu1 %v3020_v15 }
  0x83   : > { %869 = vmatpush1.msra.mxu0 %v3228_v63  ;;  %1050 = vmatpush1.msra.mxu1 %v3022_v16 }
  0x84   : > { %872 = vmatprep.subr.mxu0 %v3246_v55  ;;  %1052 = vmatprep.subr.mxu1 %v3024_v17 }
  0x85   : > { %875 = vmatpush1.msra.mxu0 %v3259_v58  ;;  %1054 = vmatpush1.msra.mxu1 %v3037_v22 }
  0x86   : > { %878 = vmatprep.subr.mxu0 %v3271_v60  ;;  %1056 = vmatprep.subr.mxu1 %v5370_v56 }
  0x87   : > { %881 = vmatpush1.msra.mxu0 %v5371_v52  ;;  %1058 = vmatpush1.msra.mxu1 %v5372_v62  ;;  %v5430_v62 = vld [vmem:[#allocation46_spill] sm:$0xff] }
  0x88   : > { %884 = vmatprep.subr.mxu0 %v5373_v33  ;;  %1060 = vmatprep.subr.mxu1 %v5374_v14  ;;  %v5416_v14 = vld [vmem:[#allocation32_spill] sm:$0xff]  ;;  %v5434_v52 = vld [vmem:[#allocation50_spill] sm:$0xff] }
  0x89   : > { %887 = vmatpush1.msra.mxu0 %v5375_v53  ;;  %1062 = vmatpush1.msra.mxu1 %v5376_v19  ;;  %v5386_v53 = vld [vmem:[#allocation13_spill] sm:$0xff]  ;;  %v5387_v19 = vld [vmem:[#allocation39_spill] sm:$0xff] }
  0x8a   : > { %890 = vmatprep.subr.mxu0 %v5377_v37  ;;  %1064 = vmatprep.subr.mxu1 %v5378_v61  ;;  %v5388_v37 = vld [vmem:[#allocation14_spill] sm:$0xff]  ;;  %v5389_v61 = vld [vmem:[#allocation41_spill] sm:$0xff] }
  0x8b   : > { %893 = vmatpush1.msra.mxu0 %v5379_v28  ;;  %1066 = vmatpush1.msra.mxu1 %v5380_v20  ;;  %v5390_v28 = vld [vmem:[#allocation15_spill] sm:$0xff] }
  0x8c   : > { %896 = vmatprep.subr.mxu0 %v5381_v47  ;;  %1068 = vmatprep.subr.mxu1 %v5382_v12  ;;  %v5391_v20 = vld [vmem:[#allocation43_spill] sm:$0xff]  ;;  %v5392_v12 = vld [vmem:[#allocation16_spill] sm:$0xff] }
  0x8d   : > { %899 = vmatpush1.msra.mxu0 %v5383_v29  ;;  %1070 = vmatpush1.msra.mxu1 %v5384_v2  ;;  %v5393_v29 = vld [vmem:[#allocation45_spill] sm:$0xff]  ;;  %v195_v47 = vld [vmem:[%s3755_s27 + $0x18] sm:$0xff] }
  0x8e   : > { %902 = vmatprep.subr.mxu0 %v5385_v7  ;;  %1072 = vmatprep.subr.mxu1 %v5386_v53  ;;  %v5394_v2 = vld [vmem:[#allocation17_spill] sm:$0xff]  ;;  %v5395_v7 = vld [vmem:[#allocation47_spill] sm:$0xff]  ;;  %v5396_v53 = vld [vmem:[#allocation18_spill] sm:$0xff] }
  0x8f   : > { %905 = vmatpush1.msra.mxu0 %v5387_v19  ;;  %1074 = vmatpush1.msra.mxu1 %v5388_v37  ;;  %v5397_v19 = vld [vmem:[#allocation49_spill] sm:$0xff]  ;;  %v5398_v37 = vld [vmem:[#allocation19_spill] sm:$0xff] }
  0x90   : > { %908 = vmatprep.subr.mxu0 %v5389_v61  ;;  %1076 = vmatprep.subr.mxu1 %v5390_v28  ;;  %v5399_v61 = vld [vmem:[#allocation51_spill] sm:$0xff]  ;;  %v5400_v28 = vld [vmem:[#allocation20_spill] sm:$0xff] }
  0x91   : > { %911 = vmatpush1.msra.mxu0 %v5391_v20  ;;  %1078 = vmatpush1.msra.mxu1 %v5392_v12  ;;  %v5401_v20 = vld [vmem:[#allocation53_spill] sm:$0xff] }
  0x92   : > { %914 = vmatprep.subr.mxu0 %v5393_v29  ;;  %1080 = vmatprep.subr.mxu1 %v5394_v2  ;;  %v5402_v12 = vld [vmem:[#allocation21_spill] sm:$0xff]  ;;  %v5403_v29 = vld [vmem:[#allocation55_spill] sm:$0xff]  ;;  %v5404_v2 = vld [vmem:[#allocation22_spill] sm:$0xff] }
  0x93   : > { %917 = vmatpush1.msra.mxu0 %v5395_v7  ;;  %1082 = vmatpush1.msra.mxu1 %v5396_v53  ;;  %v5405_v7 = vld [vmem:[#allocation57_spill] sm:$0xff]  ;;  %v5406_v53 = vld [vmem:[#allocation24_spill] sm:$0xff] }
  0x94   : > { %920 = vmatprep.subr.mxu0 %v5397_v19  ;;  %1084 = vmatprep.subr.mxu1 %v5398_v37  ;;  %v5407_v19 = vld [vmem:[#allocation59_spill] sm:$0xff]  ;;  %v5408_v37 = vld [vmem:[#allocation26_spill] sm:$0xff] }
  0x95   : > { %923 = vmatpush2.msra.mxu0 %v5399_v61  ;;  %1086 = vmatpush1.msra.mxu1 %v5400_v28  ;;  %v5409_v61 = vld [vmem:[#allocation61_spill] sm:$0xff]  ;;  %v3976_v28 = vld [vmem:[%s3755_s27 + $0x10] sm:$0xff] }
  0x96   : > { %926 = vmatprep.subr.mxu0 %v5401_v20  ;;  %1088 = vmatprep.subr.mxu1 %v5402_v12  ;;  %5410 = vst [vmem:[#allocation5_spill] sm:$0xff] %v3976_v28  ;;  %v5411_v20 = vld [vmem:[#allocation28_spill] sm:$0xff]  ;;  %v5412_v12 = vld [vmem:[#allocation63_spill] sm:$0xff] }
  0x97   : > { %929 = vmatpush2.msra.mxu0 %v5403_v29  ;;  %1090 = vmatpush1.msra.mxu1 %v5404_v2  ;;  %v3980_v29 = vand.u32 4294901760, %v195_v47  ;;  %v5414_v2 = vld [vmem:[#allocation30_spill] sm:$0xff] }
  0x98   : > { %932 = vmatprep.subr.mxu0 %v5405_v7  ;;  %1092 = vmatprep.subr.mxu1 %v5406_v53  ;;  %v5415_v7 = vld [vmem:[#allocation65_spill] sm:$0xff]  ;;  %v5417_v53 = vld [vmem:[#allocation67_spill] sm:$0xff] }
  0x99   : > { %935 = vmatpush2.msra.mxu0 %v5407_v19  ;;  %1094 = vmatpush1.msra.mxu1 %v5408_v37  ;;  %5413 = vst [vmem:[#allocation96_spill] sm:$0xff] %v3980_v29  ;;  %v3987_v37 = vand.u32 4294901760, %v3976_v28  ;;  %v5419_v19 = vld [vmem:[#allocation69_spill] sm:$0xff]  ;;  %v3994_v33 = vsub.f32 %v195_v47, %v3980_v29  ;;  %v5429_v47 = vld [vmem:[#allocation79_spill] sm:$0xff] }
  0x9a   : > { %938 = vmatprep.subr.mxu0 %v5409_v61  ;;  %1096 = vmatprep.subr.mxu1 %v5411_v20  ;;  %v5418_v61 = vld [vmem:[#allocation34_spill] sm:$0xff]  ;;  %v5420_v20 = vld [vmem:[#allocation36_spill] sm:$0xff] }
  0x9b   : > { %941 = vmatpush2.msra.mxu0 %v5412_v12  ;;  %1098 = vmatpush1.msra.mxu1 %v5414_v2  ;;  %v5421_v12 = vld [vmem:[#allocation71_spill] sm:$0xff]  ;;  %v5422_v2 = vld [vmem:[#allocation38_spill] sm:$0xff] }
  0x9c   : > { %944 = vmatprep.subr.mxu0 %v5415_v7  ;;  %1100 = vmatprep.subr.mxu1 %v5416_v14  ;;  %v5423_v7 = vld [vmem:[#allocation73_spill] sm:$0xff]  ;;  %v5424_v14 = vld [vmem:[#allocation40_spill] sm:$0xff] }
  0x9d   : > { %947 = vmatpush2.msra.mxu0 %v5417_v53  ;;  %1102 = vmatpush2.msra.mxu1 %v5418_v61  ;;  %v5425_v53 = vld [vmem:[#allocation75_spill] sm:$0xff]  ;;  %v4002_v61 = vsub.f32 %v3976_v28, %v3987_v37 }
  0x9e   : > { %950 = vmatprep.subr.mxu0 %v5419_v19  ;;  %1104 = vmatprep.subr.mxu1 %v5420_v20  ;;  %v5426_v19 = vld [vmem:[#allocation42_spill] sm:$0xff]  ;;  %v5427_v20 = vld [vmem:[#allocation77_spill] sm:$0xff] }
  0x9f   : > { %953 = vmatpush2.msra.mxu0 %v5421_v12  ;;  %1106 = vmatpush2.msra.mxu1 %v5422_v2  ;;  %v5428_v12 = vld [vmem:[#allocation44_spill] sm:$0xff]  ;;  %v5118_v2 = vand.u32 4294901760, %v3994_v33  ;;  %v5120_v28 = vand.u32 4294901760, %v4002_v61 }
  0xa0   : > { %956 = vmatprep.subr.mxu0 %v5423_v7  ;;  %1108 = vmatprep.subr.mxu1 %v5424_v14  ;;  %v5431_v7 = vld [vmem:[#allocation81_spill] sm:$0xff]  ;;  %v5432_v14 = vld [vmem:[#allocation48_spill] sm:$0xff] }
  0xa1   : > { %959 = vmatpush2.msra.mxu0 %v5425_v53  ;;  %1110 = vmatpush2.msra.mxu1 %v5426_v19  ;;  %v5433_v53 = vld [vmem:[#allocation82_spill] sm:$0xff]  ;;  %v5435_v19 = vld [vmem:[#allocation84_spill] sm:$0xff] }
  0xa2   : > { %962 = vmatprep.subr.mxu0 %v5427_v20  ;;  %1112 = vmatprep.subr.mxu1 %v5428_v12  ;;  %v5436_v20 = vld [vmem:[#allocation52_spill] sm:$0xff] }
  0xa3   : > { %965 = vmatpush2.msra.mxu0 %v5429_v47  ;;  %1114 = vmatpush2.msra.mxu1 %v5430_v62  ;;  %v407_v62 = vsub.f32 %v3994_v33, %v5118_v2  ;;  %v5437_v47 = vld [vmem:[#allocation54_spill] sm:$0xff] }
  0xa4   : > { %968 = vmatprep.subr.mxu0 %v5431_v7  ;;  %1116 = vmatprep.subr.mxu1 %v5432_v14  ;;  %v5438_v7 = vld [vmem:[#allocation88_spill] sm:$0xff] }
  0xa5   : > { %971 = vmatpush2.msra.mxu0 %v5433_v53  ;;  %1118 = vmatpush2.msra.mxu1 %v5434_v52  ;;  %v5439_v14 = vld [vmem:[#allocation56_spill] sm:$0xff]  ;;  %v5440_v52 = vld [vmem:[#allocation58_spill] sm:$0xff]  ;;  %v408_v2 = vand.u32 4294901760, %v407_v62 }
  0xa6   : > { %974 = vmatprep.subr.mxu0 %v5435_v19  ;;  %1120 = vmatprep.subr.mxu1 %v5436_v20  ;;  %v413_v19 = vsub.f32 %v4002_v61, %v5120_v28  ;;  %v5445_v28 = vld [vmem:[#allocation68_spill] sm:$0xff] }
  0xa7   : > { %977 = vmatpush2.msra.mxu0 %v3745_v50  ;;  %1122 = vmatpush2.msra.mxu1 %v5437_v47  ;;  %v5441_v50 = vld [vmem:[#allocation60_spill] sm:$0xff]  ;;  %v5442_v47 = vld [vmem:[#allocation62_spill] sm:$0xff] }
  0xa8   : > { %980 = vmatprep.subr.mxu0 %v5438_v7  ;;  %1124 = vmatprep.subr.mxu1 %v5439_v14  ;;  %v5443_v14 = vld [vmem:[#allocation64_spill] sm:$0xff]  ;;  %v5444_v7 = vld [vmem:[#allocation66_spill] sm:$0xff] }
  0xa9   : > { %983 = vmatpush2.msra.mxu0 %v3776_v32  ;;  %1126 = vmatpush2.msra.mxu1 %v5440_v52  ;;  %v414_v32 = vand.u32 4294901760, %v413_v19  ;;  %v5447_v62 = vld [vmem:[#allocation72_spill] sm:$0xff] }
  0xaa   : > { %986 = vmatprep.subr.mxu0 %v3795_v13  ;;  %1128 = vmatprep.subr.mxu1 %v5441_v50  ;;  %v5449_v19 = vld [vmem:[#allocation76_spill] sm:$0xff] }
  0xab   : > { %989 = vmatpush2.msra.mxu0 %v3807_v51  ;;  %1130 = vmatpush2.msra.mxu1 %v5442_v47  ;;  %v5446_v51 = vld [vmem:[#allocation70_spill] sm:$0xff] }
  0xac   : > { %992 = vmatprep.subr.mxu0 %v3819_v26  ;;  %1132 = vmatprep.subr.mxu1 %v5443_v14 }
  0xad   : > { %995 = vmatpush2.msra.mxu0 %v3832_v27  ;;  %1134 = vmatpush2.msra.mxu1 %v5444_v7  ;;  %v5448_v27 = vld [vmem:[#allocation74_spill] sm:$0xff] }
  0xae   : > { %998 = vmatprep.subr.mxu0 %v3843_v44  ;;  %1136 = vmatprep.subr.mxu1 %v5445_v28 }
  0xaf   : > { %409 = vmatprep.mubr.f32.mxu0 %v408_v2  ;;  %1001 = vmatpush2.msra.mxu0 %v3850_v38  ;;  %v5450_v2 = vld [vmem:[#allocation78_spill] sm:$0xff] }
  0xb0   : > { %1138 = vmatpush2.msra.mxu1 %v5446_v51  ;;  %415 = vmatmul.mubr.f32.gmra.mxu0 %v414_v32  ;;  %v5451_v32 = vand.u32 4294901760, %v3027_v18  ;;  %v5457_v18 = vld [vmem:[#allocation87_spill] sm:$0xff] }
  0xb1   : > { %1004 = vmatprep.subr.mxu0 %v3866_v1  ;;  %1140 = vmatprep.subr.mxu1 %v5447_v62 }
  0xb2   : > { %1007 = vmatpush2.msra.mxu0 %v3876_v41  ;;  %1142 = vmatpush2.msra.mxu1 %v5448_v27 }
  0xb3   : > { %1010 = vmatprep.subr.mxu0 %v3885_v34  ;;  %1144 = vmatprep.subr.mxu1 %v5449_v19  ;;  %v5452_v34 = vand.u32 4294901760, %v3040_v23  ;;  %v5458_v23 = vand.u32 4294901760, %v3069_v35  ;;  %v5463_v35 = vand.u32 4294901760, %v3839_v49 }
  0xb4   : > { %1013 = vmatpush2.msra.mxu0 %v3892_v24  ;;  %1016 = vmatprep.mubr.f32.mxu0 %v3827_v43  ;;  %v5453_v24 = vand.u32 4294901760, %v3046_v25  ;;  %v5459_v25 = vand.u32 4294901760, %v3082_v40  ;;  %v5465_v40 = vand.u32 4294901760, %v3145_v8  ;;  %v5474_v8 = vand.u32 4294901760, %v3246_v55  ;;  %v5488_v55 = vld [vmem:[#allocation9_spill] sm:$0xff] }
  0xb5   : > { %1146 = vmatpush2.msra.mxu1 %v5450_v2  ;;  %814 = vmatprep.mubr.f32.mxu1 %v3980_v29  ;;  %v5454_v2 = vld [vmem:[#allocation83_spill] sm:$0xff]  ;;  %v5455_v29 = vld [vmem:[#allocation85_spill] sm:$0xff] }
  0xb6   : > { %1019 = vmatmul.mubr.f32.vlgmr.msra.gmra.mxu0 %v3839_v49  ;;  %1148 = vmatprep.subr.mxu1 %v3700_v30  ;;  %v5456_v30 = vand.u32 4294901760, %v3060_v31  ;;  %v5461_v31 = vand.u32 4294901760, %v3827_v43  ;;  %v5468_v43 = vand.u32 4294901760, %v3168_v48  ;;  %v5479_v48 = vld [vmem:[#allocation6_spill] sm:$0xff] }
  0xb7   : > { %1191 = vmatprep.subr.mxu0 %v5451_v32  ;;  %816 = vmatmul.mubr.f32.gmra.mxu1 %v3987_v37  ;;  %v5494_v32 = vld [vmem:[#allocation11_spill] sm:$0xff] }
  0xb8   : > { %1195 = vmatpush1.msra.mxu0 %v5452_v34  ;;  %1150 = vmatpush2.msra.mxu1 %v3711_v36  ;;  %v5460_v34 = vand.u32 4294901760, %v3096_v45  ;;  %v5466_v45 = vand.u32 4294901760, %v3156_v42 }
  0xb9   : > { %1199 = vmatprep.subr.mxu0 %v5453_v24  ;;  %1152 = vmatprep.subr.mxu1 %v5454_v2  ;;  %v5464_v24 = vand.u32 4294901760, %v3134_v0  ;;  %v5470_v0 = vand.u32 4294901760, %v3182_v57  ;;  %v5482_v57 = vld [vmem:[#allocation7_spill] sm:$0xff] }
  0xba   : > { %1026 = vmatprep.mubr.f32.mxu0 %v3994_v33  ;;  %1154 = vmatpush2.msra.mxu1 %v5455_v29 }
  0xbb   : > { %1203 = vmatpush1.msra.mxu0 %v5456_v30  ;;  %1156 = vmatprep.subr.mxu1 %v5457_v18  ;;  %v5462_v30 = vand.u32 4294901760, %v3122_v59  ;;  %v5467_v59 = vand.u32 4294901760, %v3994_v33  ;;  %v5492_v33 = vld [vmem:[#allocation33_spill] sm:$0xff] }
  0xbc   : > { %1029 = vmatmul.mubr.f32.gmra.mxu0 %v4002_v61  ;;  %1207 = vmatprep.subr.mxu0 %v5458_v23  ;;  %v5495_v23 = vld [vmem:[#allocation35_spill] sm:$0xff] }
  0xbd   : > { %1158 = vmatpush2.msra.mxu1 %v3772_v21  ;;  %1211 = vmatpush1.msra.mxu0 %v5459_v25  ;;  %v5496_v25 = vand.u32 4294901760, %v5495_v23 }
  0xbe   : > { %1160 = vmatprep.subr.mxu1 %v3785_v39  ;;  %1215 = vmatprep.subr.mxu0 %v5460_v34  ;;  %v5497_v34 = vld [vmem:[#allocation12_spill] sm:$0xff] }
  0xbf   : > { %1162 = vmatpush2.msra.mxu1 %v3803_v46  ;;  %1166 = vmatprep.mubr.f32.mxu1 %v5461_v31  ;;  %v5498_v31 = vld [vmem:[#allocation37_spill] sm:$0xff] }
  0xc0   : > { %1219 = vmatpush1.msra.mxu0 %v5462_v30  ;;  %1170 = vmatmul.mubr.f32.vlgmr.msra.gmra.mxu1 %v5463_v35  ;;  %v5499_v30 = vand.u32 4294901760, %v5498_v31  ;;  %v5500_v35 = vld [vmem:[#allocation13_spill] sm:$0xff] }
  0xc1   : > { %1223 = vmatprep.subr.mxu0 %v5464_v24  ;;  %1462 = vmatprep.subr.mxu1 %v3007_v3  ;;  %v5469_v3 = vand.u32 4294901760, %v4002_v61  ;;  %v5493_v61 = vand.u32 4294901760, %v5492_v33  ;;  %v5501_v24 = vld [vmem:[#allocation39_spill] sm:$0xff] }
  0xc2   : > { %1227 = vmatpush1.msra.mxu0 %v5465_v40  ;;  %1464 = vmatpush1.msra.mxu1 %v3009_v4  ;;  %v5471_v4 = vand.u32 4294901760, %v3194_v6  ;;  %v5485_v6 = vld [vmem:[#allocation8_spill] sm:$0xff]  ;;  %v5502_v40 = vand.u32 4294901760, %v5501_v24 }
  0xc3   : > { %1231 = vmatprep.subr.mxu0 %v5466_v45  ;;  %1466 = vmatprep.subr.mxu1 %v3011_v5  ;;  %v5472_v5 = vand.u32 4294901760, %v3215_v54  ;;  %v5503_v45 = vld [vmem:[#allocation14_spill] sm:$0xff] }
  0xc4   : > { %1178 = vmatprep.mubr.f32.mxu1 %v5467_v59  ;;  %1235 = vmatpush1.msra.mxu0 %v5468_v43  ;;  %v5504_v59 = vld [vmem:[#allocation41_spill] sm:$0xff] }
  0xc5   : > { %1468 = vmatpush1.msra.mxu1 %v3013_v9  ;;  %1239 = vmatprep.subr.mxu0 %v5470_v0  ;;  %v5473_v9 = vand.u32 4294901760, %v3228_v63  ;;  %v5505_v43 = vand.u32 4294901760, %v5504_v59  ;;  %v5507_v0 = vld [vmem:[#allocation43_spill] sm:$0xff] }
  0xc6   : > { %1182 = vmatmul.mubr.f32.gmra.mxu1 %v5469_v3  ;;  %1470 = vmatprep.subr.mxu1 %v3015_v10  ;;  %v5475_v10 = vand.u32 4294901760, %v3259_v58  ;;  %v5489_v58 = vld [vmem:[#allocation31_spill] sm:$0xff] }
  0xc7   : > { %1243 = vmatpush1.msra.mxu0 %v5471_v4  ;;  %1472 = vmatpush1.msra.mxu1 %v3017_v11  ;;  %v5476_v11 = vand.u32 4294901760, %v3271_v60  ;;  %v5490_v49 = vand.u32 4294901760, %v5489_v58  ;;  %v5506_v3 = vld [vmem:[#allocation15_spill] sm:$0xff]  ;;  %v5508_v4 = vand.u32 4294901760, %v5507_v0 }
  0xc8   : > { %1247 = vmatprep.subr.mxu0 %v5472_v5  ;;  %1474 = vmatprep.subr.mxu1 %v3020_v15  ;;  %v5477_v15 = vld [vmem:[#allocation23_spill] sm:$0xff]  ;;  %v5509_v5 = vld [vmem:[#allocation16_spill] sm:$0xff] }
  0xc9   : > { %1251 = vmatpush1.msra.mxu0 %v5473_v9  ;;  %1476 = vmatpush1.msra.mxu1 %v3022_v16  ;;  %v5478_v42 = vand.u32 4294901760, %v5477_v15  ;;  %v5480_v16 = vld [vmem:[#allocation25_spill] sm:$0xff] }
  0xca   : > { %1255 = vmatprep.subr.mxu0 %v5474_v8  ;;  %1478 = vmatprep.subr.mxu1 %v3024_v17  ;;  %v5481_v54 = vand.u32 4294901760, %v5480_v16  ;;  %v5483_v17 = vld [vmem:[#allocation27_spill] sm:$0xff]  ;;  %v5510_v9 = vld [vmem:[#allocation45_spill] sm:$0xff] }
  0xcb   : > { %1259 = vmatpush1.msra.mxu0 %v5475_v10  ;;  %1480 = vmatpush1.msra.mxu1 %v3037_v22  ;;  %v5484_v63 = vand.u32 4294901760, %v5483_v17  ;;  %v5486_v22 = vld [vmem:[#allocation29_spill] sm:$0xff]  ;;  %v5511_v8 = vand.u32 4294901760, %v5510_v9 }
  0xcc   : > { %1263 = vmatprep.subr.mxu0 %v5476_v11  ;;  %1482 = vmatprep.subr.mxu1 %v5370_v56  ;;  %v5487_v60 = vand.u32 4294901760, %v5486_v22  ;;  %v5491_v56 = vld [vmem:[#allocation10_spill] sm:$0xff]  ;;  %v5512_v10 = vld [vmem:[#allocation17_spill] sm:$0xff]  ;;  %v5513_v11 = vld [vmem:[#allocation47_spill] sm:$0xff] }
  0xcd   : > { %1267 = vmatpush1.msra.mxu0 %v5478_v42  ;;  %1484 = vmatpush1.msra.mxu1 %v5479_v48  ;;  %v5514_v15 = vand.u32 4294901760, %v5513_v11  ;;  %v5515_v42 = vld [vmem:[#allocation18_spill] sm:$0xff]  ;;  %v5516_v48 = vld [vmem:[#allocation49_spill] sm:$0xff] }
  0xce   : > { %1271 = vmatprep.subr.mxu0 %v5481_v54  ;;  %1486 = vmatprep.subr.mxu1 %v5482_v57  ;;  %v5517_v16 = vand.u32 4294901760, %v5516_v48  ;;  %v5518_v54 = vld [vmem:[#allocation19_spill] sm:$0xff] }
  0xcf   : > { %1275 = vmatpush1.msra.mxu0 %v5484_v63  ;;  %1488 = vmatpush1.msra.mxu1 %v5485_v6  ;;  %v5519_v57 = vld [vmem:[#allocation51_spill] sm:$0xff]  ;;  %v5521_v63 = vld [vmem:[#allocation20_spill] sm:$0xff]  ;;  %v5522_v6 = vld [vmem:[#allocation53_spill] sm:$0xff] }
  0xd0   : > { %1279 = vmatprep.subr.mxu0 %v5487_v60  ;;  %1490 = vmatprep.subr.mxu1 %v5488_v55  ;;  %v5520_v17 = vand.u32 4294901760, %v5519_v57  ;;  %v5523_v22 = vand.u32 4294901760, %v5522_v6  ;;  %v5524_v60 = vld [vmem:[#allocation21_spill] sm:$0xff]  ;;  %v5525_v55 = vld [vmem:[#allocation55_spill] sm:$0xff] }
  0xd1   : > { %1283 = vmatpush1.msra.mxu0 %v5490_v49  ;;  %1492 = vmatpush1.msra.mxu1 %v5491_v56  ;;  %v5526_v58 = vand.u32 4294901760, %v5525_v55  ;;  %v5527_v49 = vld [vmem:[#allocation22_spill] sm:$0xff]  ;;  %v5528_v56 = vld [vmem:[#allocation57_spill] sm:$0xff] }
  0xd2   : > { %1287 = vmatprep.subr.mxu0 %v5493_v61  ;;  %1494 = vmatprep.subr.mxu1 %v5494_v32  ;;  %v5529_v33 = vand.u32 4294901760, %v5528_v56  ;;  %v5530_v61 = vld [vmem:[#allocation24_spill] sm:$0xff]  ;;  %v5531_v32 = vld [vmem:[#allocation59_spill] sm:$0xff]  ;;  %v5562_v55 = vld [vmem:[#allocation46_spill] sm:$0xff] }
  0xd3   : > { %1291 = vmatpush1.msra.mxu0 %v5496_v25  ;;  %1496 = vmatpush1.msra.mxu1 %v5497_v34  ;;  %v5532_v23 = vand.u32 4294901760, %v5531_v32  ;;  %v5533_v25 = vld [vmem:[#allocation26_spill] sm:$0xff]  ;;  %v5534_v34 = vld [vmem:[#allocation61_spill] sm:$0xff]  ;;  %v5565_v56 = vld [vmem:[#allocation48_spill] sm:$0xff] }
  0xd4   : > { %1295 = vmatprep.subr.mxu0 %v5499_v30  ;;  %1498 = vmatprep.subr.mxu1 %v5500_v35  ;;  %v5535_v31 = vand.u32 4294901760, %v5534_v34  ;;  %v5536_v30 = vld [vmem:[#allocation28_spill] sm:$0xff]  ;;  %v5537_v35 = vld [vmem:[#allocation63_spill] sm:$0xff]  ;;  %v5572_v34 = vld [vmem:[#allocation54_spill] sm:$0xff] }
  0xd5   : > { %1299 = vmatpush1.msra.mxu0 %v5502_v40  ;;  %1500 = vmatpush1.msra.mxu1 %v5503_v45  ;;  %v5538_v24 = vand.u32 4294901760, %v5537_v35  ;;  %v5539_v40 = vld [vmem:[#allocation30_spill] sm:$0xff]  ;;  %v5540_v45 = vld [vmem:[#allocation65_spill] sm:$0xff]  ;;  %v5568_v32 = vld [vmem:[#allocation84_spill] sm:$0xff] }
  0xd6   : > { %1303 = vmatprep.subr.mxu0 %v5505_v43  ;;  %1502 = vmatprep.subr.mxu1 %v5506_v3  ;;  %v5541_v59 = vand.u32 4294901760, %v5540_v45  ;;  %v5542_v43 = vld [vmem:[#allocation32_spill] sm:$0xff]  ;;  %v5543_v3 = vld [vmem:[#allocation67_spill] sm:$0xff] }
  0xd7   : > { %1307 = vmatpush1.msra.mxu0 %v5508_v4  ;;  %1504 = vmatpush1.msra.mxu1 %v5509_v5  ;;  %v5544_v0 = vand.u32 4294901760, %v5543_v3  ;;  %v5545_v4 = vld [vmem:[#allocation34_spill] sm:$0xff]  ;;  %v5546_v5 = vld [vmem:[#allocation69_spill] sm:$0xff]  ;;  %v5575_v35 = vld [vmem:[#allocation56_spill] sm:$0xff] }
  0xd8   : > { %1311 = vmatprep.subr.mxu0 %v5511_v8  ;;  %1506 = vmatprep.subr.mxu1 %v5512_v10  ;;  %v5547_v9 = vand.u32 4294901760, %v5546_v5  ;;  %v5548_v8 = vld [vmem:[#allocation36_spill] sm:$0xff]  ;;  %v5549_v10 = vld [vmem:[#allocation71_spill] sm:$0xff]  ;;  %v1638_v5 = vld [vmem:[%s4913_s2 + $0x60] sm:$0xff] }
  0xd9   : > { %1315 = vmatpush1.msra.mxu0 %v5514_v15  ;;  %1508 = vmatpush1.msra.mxu1 %v5515_v42  ;;  %v5550_v11 = vand.u32 4294901760, %v5549_v10  ;;  %v5551_v15 = vld [vmem:[#allocation38_spill] sm:$0xff]  ;;  %v5552_v42 = vld [vmem:[#allocation73_spill] sm:$0xff] }
  0xda   : > { %1319 = vmatprep.subr.mxu0 %v5517_v16  ;;  %1510 = vmatprep.subr.mxu1 %v5518_v54  ;;  %v5553_v48 = vand.u32 4294901760, %v5552_v42  ;;  %v5554_v16 = vld [vmem:[#allocation40_spill] sm:$0xff]  ;;  %v5555_v54 = vld [vmem:[#allocation75_spill] sm:$0xff] }
  0xdb   : > { %1323 = vmatpush2.msra.mxu0 %v5520_v17  ;;  %1512 = vmatpush1.msra.mxu1 %v5521_v63  ;;  %v5556_v57 = vand.u32 4294901760, %v5555_v54  ;;  %v5557_v17 = vld [vmem:[#allocation42_spill] sm:$0xff]  ;;  %v5558_v63 = vld [vmem:[#allocation77_spill] sm:$0xff] }
  0xdc   : > { %1327 = vmatprep.subr.mxu0 %v5523_v22  ;;  %1514 = vmatprep.subr.mxu1 %v5524_v60  ;;  %v5559_v6 = vand.u32 4294901760, %v5558_v63  ;;  %v5560_v22 = vld [vmem:[#allocation79_spill] sm:$0xff] }
  0xdd   : > { %1331 = vmatpush2.msra.mxu0 %v5526_v58  ;;  %1516 = vmatpush1.msra.mxu1 %v5527_v49  ;;  %v5561_v60 = vand.u32 4294901760, %v5560_v22  ;;  %v5563_v58 = vld [vmem:[#allocation81_spill] sm:$0xff] }
  0xde   : > { %1335 = vmatprep.subr.mxu0 %v5529_v33  ;;  %1518 = vmatprep.subr.mxu1 %v5530_v61  ;;  %v5564_v49 = vand.u32 4294901760, %v5563_v58  ;;  %v5566_v33 = vand.u32 4294901760, %v5433_v53  ;;  %v5567_v61 = vld [vmem:[#allocation50_spill] sm:$0xff] }
  0xdf   : > { %1339 = vmatpush2.msra.mxu0 %v5532_v23  ;;  %1520 = vmatpush1.msra.mxu1 %v5533_v25  ;;  %v5569_v23 = vand.u32 4294901760, %v5568_v32 }
  0xe0   : > { %1343 = vmatprep.subr.mxu0 %v5535_v31  ;;  %1522 = vmatprep.subr.mxu1 %v5536_v30  ;;  %v5573_v31 = vld [vmem:[#allocation88_spill] sm:$0xff] }
  0xe1   : > { %1347 = vmatpush2.msra.mxu0 %v5538_v24  ;;  %1524 = vmatpush1.msra.mxu1 %v5539_v40  ;;  %v5574_v30 = vand.u32 4294901760, %v5573_v31  ;;  %v5576_v24 = vld [vmem:[#allocation89_spill] sm:$0xff]  ;;  %v5578_v40 = vand.u32 4294901760, %v3795_v13  ;;  %v5584_v13 = vand.u32 4294901760, %v3843_v44  ;;  %v1652_v31 = vld [vmem:[%s4913_s2 + $0xd0] sm:$0xff] }
  0xe2   : > { %1351 = vmatprep.subr.mxu0 %v5541_v59  ;;  %1526 = vmatprep.subr.mxu1 %v5542_v43  ;;  %v5577_v53 = vand.u32 4294901760, %v5576_v24  ;;  %v5581_v59 = vand.u32 4294901760, %v3819_v26  ;;  %v5582_v43 = vld [vmem:[#allocation93_spill] sm:$0xff]  ;;  %v5586_v26 = vand.u32 4294901760, %v3866_v1  ;;  %v5594_v1 = vld [vmem:[#allocation92_spill] sm:$0xff] }
  0xe3   : > { %1355 = vmatpush2.msra.mxu0 %v5544_v0  ;;  %1528 = vmatpush2.msra.mxu1 %v5545_v4  ;;  %v5583_v3 = vand.u32 4294901760, %v5582_v43  ;;  %v1654_v4 = vld [vmem:[%s4913_s2 + $0xe0] sm:$0xff] }
  0xe4   : > { %1359 = vmatprep.subr.mxu0 %v5547_v9  ;;  %1530 = vmatprep.subr.mxu1 %v5548_v8 }
  0xe5   : > { %1363 = vmatpush2.msra.mxu0 %v5550_v11  ;;  %1532 = vmatpush2.msra.mxu1 %v5551_v15  ;;  %v4316_v11 = vand.u32 4294901760, %v1654_v4 }
  0xe6   : > { %1367 = vmatprep.subr.mxu0 %v5553_v48  ;;  %1534 = vmatprep.subr.mxu1 %v5554_v16  ;;  %v4328_v16 = vand.u32 4294901760, %v1638_v5 }
  0xe7   : > { %1371 = vmatpush2.msra.mxu0 %v5556_v57  ;;  %1536 = vmatpush2.msra.mxu1 %v5557_v17  ;;  %v4335_v63 = vsub.f32 %v1654_v4, %v4316_v11 }
  0xe8   : > { %1375 = vmatprep.subr.mxu0 %v5559_v6  ;;  %1538 = vmatprep.subr.mxu1 %v5428_v12  ;;  %v5570_v12 = vld [vmem:[#allocation86_spill] sm:$0xff] }
  0xe9   : > { %1379 = vmatpush2.msra.mxu0 %v5561_v60  ;;  %1540 = vmatpush2.msra.mxu1 %v5562_v55  ;;  %v5571_v25 = vand.u32 4294901760, %v5570_v12  ;;  %v4342_v55 = vsub.f32 %v1638_v5, %v4328_v16 }
  0xea   : > { %1383 = vmatprep.subr.mxu0 %v5564_v49  ;;  %1542 = vmatprep.subr.mxu1 %v5565_v56 }
  0xeb   : > { %1387 = vmatpush2.msra.mxu0 %v5566_v33  ;;  %1544 = vmatpush2.msra.mxu1 %v5567_v61  ;;  %v5139_v33 = vand.u32 4294901760, %v4335_v63  ;;  %v5137_v12 = vand.u32 4294901760, %v4342_v55 }
  0xec   : > { %1391 = vmatprep.subr.mxu0 %v5569_v23  ;;  %1546 = vmatprep.subr.mxu1 %v5436_v20  ;;  %v5579_v20 = vld [vmem:[#allocation90_spill] sm:$0xff] }
  0xed   : > { %1395 = vmatpush2.msra.mxu0 %v5571_v25  ;;  %1548 = vmatpush2.msra.mxu1 %v5572_v34  ;;  %v5580_v45 = vand.u32 4294901760, %v5579_v20  ;;  %v1653_v25 = vld [vmem:[%s4913_s2 + $0xd8] sm:$0xff]  ;;  %v1651_v20 = vld [vmem:[%s4913_s2 + $0xc8] sm:$0xff] }
  0xee   : > { %1399 = vmatprep.subr.mxu0 %v5574_v30  ;;  %1550 = vmatprep.subr.mxu1 %v5575_v35  ;;  %v1637_v34 = vld [vmem:[%s4913_s2 + $0x58] sm:$0xff] }
  0xef   : > { %1403 = vmatpush2.msra.mxu0 %v5577_v53  ;;  %1552 = vmatpush2.msra.mxu1 %v5440_v52  ;;  %v5587_v52 = vand.u32 4294901760, %v3876_v41  ;;  %v5596_v41 = vld [vmem:[#allocation96_spill] sm:$0xff]  ;;  %v1922_v53 = vsub.f32 %v4335_v63, %v5139_v33 }
  0xf0   : > { %1407 = vmatprep.subr.mxu0 %v5578_v40  ;;  %1554 = vmatprep.subr.mxu1 %v5441_v50  ;;  %v5585_v50 = vand.u32 4294901760, %v3850_v38  ;;  %v1636_v40 = vld [vmem:[%s4913_s2 + $0x50] sm:$0xff] }
  0xf1   : > { %1411 = vmatpush2.msra.mxu0 %v5580_v45  ;;  %1556 = vmatpush2.msra.mxu1 %v5442_v47  ;;  %v5595_v47 = vld [vmem:[#allocation80_spill] sm:$0xff] }
  0xf2   : > { %1415 = vmatprep.subr.mxu0 %v5581_v59  ;;  %1558 = vmatprep.subr.mxu1 %v5443_v14  ;;  %v5590_v14 = vld [vmem:[#allocation95_spill] sm:$0xff]  ;;  %v1810_v59 = vsub.f32 %v4342_v55, %v5137_v12 }
  0xf3   : > { %1419 = vmatpush2.msra.mxu0 %v5583_v3  ;;  %1560 = vmatpush2.msra.mxu1 %v5444_v7  ;;  %v5588_v7 = vld [vmem:[#allocation94_spill] sm:$0xff]  ;;  %v5591_v38 = vand.u32 4294901760, %v5590_v14  ;;  %v4390_v3 = vand.u32 4294901760, %v1653_v25 }
  0xf4   : > { %1423 = vmatprep.subr.mxu0 %v5584_v13  ;;  %1562 = vmatprep.subr.mxu1 %v5445_v28  ;;  %v5589_v44 = vand.u32 4294901760, %v5588_v7  ;;  %v5592_v28 = vld [vmem:[#allocation91_spill] sm:$0xff]  ;;  %v4392_v13 = vand.u32 4294901760, %v1637_v34  ;;  %v4398_v7 = vand.u32 4294901760, %v1651_v20 }
  0xf5   : > { %1427 = vmatpush2.msra.mxu0 %v5585_v50  ;;  %1564 = vmatpush2.msra.mxu1 %v5446_v51  ;;  %v5593_v51 = vld [vmem:[#allocation78_spill] sm:$0xff]  ;;  %v4394_v50 = vand.u32 4294901760, %v1652_v31  ;;  %v4401_v14 = vsub.f32 %v1653_v25, %v4390_v3 }
  0xf6   : > { %1431 = vmatprep.subr.mxu0 %v5586_v26  ;;  %1566 = vmatprep.subr.mxu1 %v5447_v62  ;;  %v1655_v62 = vld [vmem:[%s4913_s2 + $0xe8] sm:$0xff] }
  0xf7   : > { %1435 = vmatpush2.msra.mxu0 %v5587_v52  ;;  %1568 = vmatpush2.msra.mxu1 %v5448_v27  ;;  %v1641_v27 = vld [vmem:[%s4913_s2 + $0x78] sm:$0xff]  ;;  %v4396_v52 = vand.u32 4294901760, %v1636_v40  ;;  %v1635_v25 = vld [vmem:[%s4913_s2 + $0x48] sm:$0xff] }
  0xf8   : > { %1439 = vmatprep.subr.mxu0 %v5589_v44  ;;  %1570 = vmatprep.subr.mxu1 %v5449_v19  ;;  %v1639_v19 = vld [vmem:[%s4913_s2 + $0x68] sm:$0xff]  ;;  %v1923_v44 = vand.u32 4294901760, %v1922_v53 }
  0xf9   : > { %1443 = vmatpush2.msra.mxu0 %v5591_v38  ;;  %1445 = vmatprep.mubr.f32.mxu0 %v5592_v28  ;;  %v4299_v0 = vand.u32 4294901760, %v1639_v19  ;;  %v4404_v38 = vsub.f32 %v1637_v34, %v4392_v13  ;;  %v4443_v34 = vand.u32 4294901760, %v1635_v25 }
  0xfa   : > { %1572 = vmatpush2.msra.mxu1 %v5593_v51  ;;  %1447 = vmatmul.mubr.f32.vlgmr.msra.gmra.mxu0 %v5594_v1  ;;  %v1811_v51 = vand.u32 4294901760, %v1810_v59  ;;  %v1633_v59 = vld [vmem:[%s4913_s2 + $0x38] sm:$0xff] }
  0xfb   : > { %1574 = vmatprep.subr.mxu1 %v5595_v47  ;;  %1453 = vmatprep.mubr.f32.mxu0 %v5596_v41  ;;  %v4326_v48 = vsub.f32 %v1639_v19, %v4299_v0  ;;  %v4414_v47 = vsub.f32 %v1651_v20, %v4398_v7 }
  0xfc   : > { %1576 = vmatpush2.msra.mxu1 %v3711_v36  ;;  %1590 = vmatprep.mubr.f32.mxu1 %v5592_v28  ;;  %v1657_v36 = vld [vmem:[%s4913_s2 + $0xf8] sm:$0xff]  ;;  %v4407_v28 = vsub.f32 %v1652_v31, %v4394_v50  ;;  %v1650_v31 = vld [vmem:[%s4913_s2 + $0xc0] sm:$0xff] }
  0xfd   : > { %1578 = vmatprep.subr.mxu1 %v5454_v2  ;;  %v5140_v60 = vand.u32 4294901760, %v4326_v48  ;;  %5601 = vst [vmem:[#allocation60_spill] sm:$0xff] %v4414_v47 }
  0xfe   : > { %1580 = vmatpush2.msra.mxu1 %v5455_v29  ;;  %1455 = vmatmul.mubr.f32.gmra.mxu0 %v3987_v37  ;;  %5599 = vst [vmem:[#allocation52_spill] sm:$0xff] %v4407_v28 }
  0xff   : > { %1582 = vmatprep.subr.mxu1 %v5457_v18  ;;  %v4297_v18 = vand.u32 4294901760, %v1655_v62  ;;  %v1803_v23 = vsub.f32 %v4326_v48, %v5140_v60 }
 0x100   : > { %1584 = vmatpush2.msra.mxu1 %v3772_v21  ;;  %v4280_v21 = vand.u32 4294901760, %v1657_v36 }
 0x101   : > { %1586 = vmatprep.subr.mxu1 %v3785_v39  ;;  %v1656_v39 = vld [vmem:[%s4913_s2 + $0xf0] sm:$0xff]  ;;  %v4323_v42 = vsub.f32 %v1655_v62, %v4297_v18  ;;  %v1804_v26 = vand.u32 4294901760, %v1803_v23 }
 0x102   : > { %1588 = vmatpush2.msra.mxu1 %v3803_v46  ;;  %5597 = vst [vmem:[#allocation44_spill] sm:$0xff] %v4280_v21  ;;  %v4282_v46 = vand.u32 4294901760, %v1641_v27  ;;  %v4284_v29 = vand.u32 4294901760, %v1656_v39  ;;  %v4308_v9 = vsub.f32 %v1657_v36, %v4280_v21  ;;  %2662 = vmatprep.subr.mxu0 %v4280_v21  ;;  %v5134_v36 = vand.u32 4294901760, %v4404_v38 }
 0x103   : > { %1592 = vmatmul.mubr.f32.vlgmr.msra.gmra.mxu1 %v5594_v1  ;;  %v5142_v22 = vand.u32 4294901760, %v4323_v42  ;;  %v4411_v1 = vsub.f32 %v1636_v40, %v4396_v52  ;;  %v1649_v40 = vld [vmem:[%s4913_s2 + $0xb8] sm:$0xff] }
 0x104   : > { %1598 = vmatprep.mubr.f32.mxu1 %v5596_v41  ;;  %5598 = vst [vmem:[#allocation82_spill] sm:$0xff] %v4308_v9  ;;  %v4311_v8 = vsub.f32 %v1641_v27, %v4282_v46  ;;  %v4314_v10 = vsub.f32 %v1656_v39, %v4284_v29  ;;  %2663 = vmatpush3.msra.mxu0 %v4282_v46  ;;  %v5148_v54 = vand.u32 4294901760, %v4308_v9  ;;  %v5135_v41 = vand.u32 4294901760, %v4401_v14 }
 0x105   : > { %2664 = vmatprep.subr.mxu0 %v4284_v29  ;;  %v1915_v32 = vsub.f32 %v4323_v42, %v5142_v22  ;;  %5600 = vst [vmem:[#allocation58_spill] sm:$0xff] %v4411_v1  ;;  %v5132_v27 = vand.u32 4294901760, %v4407_v28  ;;  %v5131_v39 = vand.u32 4294901760, %v4411_v1  ;;  %v1817_v19 = vsub.f32 %v4404_v38, %v5134_v36 }
 0x106   : > { %v5147_v57 = vand.u32 4294901760, %v4311_v8  ;;  %v5146_v17 = vand.u32 4294901760, %v4314_v10  ;;  %v1901_v58 = vsub.f32 %v4308_v9, %v5148_v54  ;;  %v1929_v62 = vsub.f32 %v4401_v14, %v5135_v41 }
 0x107   : > { %1600 = vmatmul.mubr.f32.gmra.mxu1 %v3987_v37  ;;  %v1640_v37 = vld [vmem:[%s4913_s2 + $0x70] sm:$0xff]  ;;  %v1916_v43 = vand.u32 4294901760, %v1915_v32  ;;  %v1936_v4 = vsub.f32 %v4407_v28, %v5132_v27  ;;  %v1824_v5 = vsub.f32 %v4411_v1, %v5131_v39 }
 0x108   : > { %v4295_v2 = vand.u32 4294901760, %v1640_v37  ;;  %v1789_v49 = vsub.f32 %v4311_v8, %v5147_v57  ;;  %v1908_v56 = vsub.f32 %v4314_v10, %v5146_v17  ;;  %v1902_v30 = vand.u32 4294901760, %v1901_v58 }
 0x109   : > { %v1825_v32 = vand.u32 4294901760, %v1824_v5  ;;  %v1632_v5 = vld [vmem:[%s4913_s2 + $0x30] sm:$0xff] }
 0x10a   : > { %v4320_v15 = vsub.f32 %v1640_v37, %v4295_v2  ;;  %2665 = vmatpush3.msra.mxu0 %v4295_v2  ;;  %v1790_v35 = vand.u32 4294901760, %v1789_v49  ;;  %v1909_v24 = vand.u32 4294901760, %v1908_v56  ;;  %2700 = vmatprep.subr.mxu1 %v1902_v30  ;;  %v5130_v37 = vand.u32 4294901760, %v4414_v47 }
 0x10b   : > { %2666 = vmatprep.subr.mxu0 %v4297_v18  ;;  %v1930_v49 = vand.u32 4294901760, %v1929_v62  ;;  %v1818_v56 = vand.u32 4294901760, %v1817_v19  ;;  %v4448_v30 = vand.u32 4294901760, %v1650_v31 }
 0x10c   : > { %v5145_v6 = vand.u32 4294901760, %v4320_v15  ;;  %2667 = vmatpush3.msra.mxu0 %v4299_v0  ;;  %2701 = vmatpush3.msra.mxu1 %v1790_v35  ;;  %v1943_v58 = vsub.f32 %v4414_v47, %v5130_v37  ;;  %v1634_v35 = vld [vmem:[%s4913_s2 + $0x40] sm:$0xff] }
 0x10d   : > { %2668 = vmatprep.subr.mxu0 %v4316_v11  ;;  %2702 = vmatprep.subr.mxu1 %v1909_v24  ;;  %v4454_v24 = vsub.f32 %v1635_v25, %v4443_v34  ;;  %v4456_v53 = vand.u32 4294901760, %v1634_v35  ;;  %v4463_v20 = vsub.f32 %v1650_v31, %v4448_v30 }
 0x10e   : > { %v1796_v61 = vsub.f32 %v4320_v15, %v5145_v6  ;;  %2669 = vmatpush3.msra.mxu0 %v4328_v16  ;;  %v1944_v23 = vand.u32 4294901760, %v1943_v58 }
 0x10f   : > { %2670 = vmatprep.subr.mxu0 %v4390_v3  ;;  %5602 = vst [vmem:[#allocation62_spill] sm:$0xff] %v4454_v24  ;;  %5603 = vst [vmem:[#allocation64_spill] sm:$0xff] %v4463_v20  ;;  %v5129_v62 = vand.u32 4294901760, %v4463_v20 }
 0x110   : > { %v1797_v45 = vand.u32 4294901760, %v1796_v61  ;;  %2671 = vmatpush3.msra.mxu0 %v4392_v13  ;;  %v1937_v61 = vand.u32 4294901760, %v1936_v4 }
 0x111   : > { %2672 = vmatprep.subr.mxu0 %v4394_v50 }
 0x112   : > { %2703 = vmatpush3.msra.mxu1 %v1797_v45  ;;  %2673 = vmatpush3.msra.mxu0 %v4396_v52  ;;  %v4465_v45 = vand.u32 4294901760, %v1649_v40 }
 0x113   : > { %2704 = vmatprep.subr.mxu1 %v1916_v43  ;;  %2674 = vmatprep.subr.mxu0 %v4398_v7  ;;  %v5128_v43 = vand.u32 4294901760, %v4454_v24 }
 0x114   : > { %2705 = vmatpush3.msra.mxu1 %v1804_v26  ;;  %2675 = vmatpush3.msra.mxu0 %v4443_v34  ;;  %v4473_v26 = vsub.f32 %v1634_v35, %v4456_v53  ;;  %v4483_v19 = vsub.f32 %v1649_v40, %v4465_v45  ;;  %v1631_v40 = vld [vmem:[%s4913_s2 + $0x28] sm:$0xff] }
 0x115   : > { %2706 = vmatprep.subr.mxu1 %v1923_v44  ;;  %2676 = vmatprep.subr.mxu0 %v4448_v30  ;;  %v4475_v44 = vand.u32 4294901760, %v1633_v59  ;;  %v1831_v58 = vsub.f32 %v4454_v24, %v5128_v43 }
 0x116   : > { %2707 = vmatpush3.msra.mxu1 %v1811_v51  ;;  %5604 = vst [vmem:[#allocation66_spill] sm:$0xff] %v4473_v26  ;;  %v1648_v51 = vld [vmem:[%s4913_s2 + $0xb0] sm:$0xff]  ;;  %2677 = vmatpush3.msra.mxu0 %v4456_v53  ;;  %5606 = vst [vmem:[#allocation70_spill] sm:$0xff] %v4483_v19  ;;  %v5136_v25 = vand.u32 4294901760, %v4483_v19 }
 0x117   : > { %2708 = vmatprep.subr.mxu1 %v1930_v49  ;;  %5605 = vst [vmem:[#allocation68_spill] sm:$0xff] %v4475_v44  ;;  %v4485_v4 = vand.u32 4294901760, %v1648_v51  ;;  %2678 = vmatprep.subr.mxu0 %v4465_v45  ;;  %v5133_v49 = vand.u32 4294901760, %v4473_v26 }
 0x118   : > { %2709 = vmatpush3.msra.mxu1 %v1818_v56  ;;  %v4496_v56 = vsub.f32 %v1633_v59, %v4475_v44  ;;  %2679 = vmatpush3.msra.mxu0 %v4475_v44  ;;  %v1832_v59 = vand.u32 4294901760, %v1831_v58  ;;  %v1957_v58 = vsub.f32 %v4483_v19, %v5136_v25  ;;  %v1630_v25 = vld [vmem:[%s4913_s2 + $0x20] sm:$0xff] }
 0x119   : > { %2710 = vmatprep.subr.mxu1 %v1937_v61  ;;  %5607 = vst [vmem:[#allocation72_spill] sm:$0xff] %v4485_v4  ;;  %v4498_v61 = vand.u32 4294901760, %v1632_v5  ;;  %v4509_v31 = vsub.f32 %v1648_v51, %v4485_v4  ;;  %2680 = vmatprep.subr.mxu0 %v4485_v4  ;;  %v1838_v43 = vsub.f32 %v4473_v26, %v5133_v49  ;;  %v1646_v51 = vld [vmem:[%s4913_s2 + $0xa0] sm:$0xff]  ;;  %v4570_v22 = vand.u32 4294901760, %v1630_v25 }
 0x11a   : > { %2711 = vmatpush3.msra.mxu1 %v1825_v32  ;;  %5608 = vst [vmem:[#allocation74_spill] sm:$0xff] %v4496_v56  ;;  %v1647_v32 = vld [vmem:[%s4913_s2 + $0xa8] sm:$0xff]  ;;  %v1958_v12 = vand.u32 4294901760, %v1957_v58  ;;  %v1629_v58 = vld [vmem:[%s4913_s2 + $0x18] sm:$0xff] }
 0x11b   : > { %2712 = vmatprep.subr.mxu1 %v1944_v23  ;;  %5609 = vst [vmem:[#allocation76_spill] sm:$0xff] %v4498_v61  ;;  %v1950_v23 = vsub.f32 %v4463_v20, %v5129_v62  ;;  %5610 = vst [vmem:[#allocation83_spill] sm:$0xff] %v4509_v31  ;;  %v4511_v35 = vand.u32 4294901760, %v1647_v32  ;;  %v5138_v62 = vand.u32 4294901760, %v4496_v56  ;;  %v4522_v37 = vsub.f32 %v1632_v5, %v4498_v61 }
 0x11c   : > { %2681 = vmatpush3.msra.mxu0 %v4498_v61  ;;  %v5141_v27 = vand.u32 4294901760, %v4509_v31  ;;  %2713 = vmatpush3.msra.mxu1 %v1832_v59  ;;  %v1839_v5 = vand.u32 4294901760, %v1838_v43  ;;  %v4549_v59 = vand.u32 4294901760, %v1646_v51  ;;  %5618 = vst [vmem:[#allocation8_spill] sm:$0xff] %v4570_v22  ;;  %v4584_v17 = vsub.f32 %v1630_v25, %v4570_v22  ;;  %v2913_v61 = vld [vmem:[%s3755_s27 + $0x18] sm:$0xff] }
 0x11d   : > { %5611 = vst [vmem:[#allocation85_spill] sm:$0xff] %v4511_v35  ;;  %5612 = vst [vmem:[#allocation87_spill] sm:$0xff] %v4522_v37  ;;  %v1951_v39 = vand.u32 4294901760, %v1950_v23  ;;  %v4533_v49 = vsub.f32 %v1647_v32, %v4511_v35  ;;  %2682 = vmatprep.subr.mxu0 %v4511_v35  ;;  %v1845_v36 = vsub.f32 %v4496_v56, %v5138_v62  ;;  %v5143_v41 = vand.u32 4294901760, %v4522_v37  ;;  %v1645_v62 = vld [vmem:[%s4913_s2 + $0x98] sm:$0xff] }
 0x11e   : > { %v4540_v23 = vand.u32 4294901760, %v1631_v40  ;;  %v1964_v32 = vsub.f32 %v4509_v31, %v5141_v27  ;;  %5615 = vst [vmem:[#allocation25_spill] sm:$0xff] %v4549_v59  ;;  %5620 = vst [vmem:[#allocation9_spill] sm:$0xff] %v4584_v17  ;;  %v4586_v57 = vand.u32 4294901760, %v1629_v58 }
 0x11f   : > { %5613 = vst [vmem:[#allocation23_spill] sm:$0xff] %v4533_v49  ;;  %2714 = vmatprep.subr.mxu1 %v1951_v39  ;;  %v5144_v43 = vand.u32 4294901760, %v4533_v49  ;;  %v1846_v33 = vand.u32 4294901760, %v1845_v36  ;;  %v1852_v60 = vsub.f32 %v4522_v37, %v5143_v41  ;;  %v4568_v36 = vsub.f32 %v1646_v51, %v4549_v59  ;;  %v1628_v41 = vld [vmem:[%s4913_s2 + $0x10] sm:$0xff] }
 0x120   : > { %5614 = vst [vmem:[#allocation6_spill] sm:$0xff] %v4540_v23  ;;  %2715 = vmatpush3.msra.mxu1 %v1839_v5  ;;  %v4558_v39 = vsub.f32 %v1631_v40, %v4540_v23  ;;  %2683 = vmatpush3.msra.mxu0 %v4540_v23  ;;  %v1965_v27 = vand.u32 4294901760, %v1964_v32  ;;  %v1644_v40 = vld [vmem:[%s4913_s2 + $0x90] sm:$0xff]  ;;  %5621 = vst [vmem:[#allocation31_spill] sm:$0xff] %v4586_v57 }
 0x121   : > { %2716 = vmatprep.subr.mxu1 %v1958_v12  ;;  %v1971_v5 = vsub.f32 %v4533_v49, %v5144_v43  ;;  %5617 = vst [vmem:[#allocation27_spill] sm:$0xff] %v4568_v36  ;;  %2684 = vmatprep.subr.mxu0 %v4549_v59  ;;  %v1853_v12 = vand.u32 4294901760, %v1852_v60  ;;  %v4580_v43 = vand.u32 4294901760, %v1645_v62  ;;  %v5154_v6 = vand.u32 4294901760, %v4568_v36 }
 0x122   : > { %5616 = vst [vmem:[#allocation7_spill] sm:$0xff] %v4558_v39  ;;  %2717 = vmatpush3.msra.mxu1 %v1846_v33  ;;  %v5149_v32 = vand.u32 4294901760, %v4558_v39  ;;  %2685 = vmatpush3.msra.mxu0 %v4570_v22  ;;  %v4595_v54 = vand.u32 4294901760, %v1644_v40  ;;  %v5636_v22 = vld [vmem:[#allocation5_spill] sm:$0xff] }
 0x123   : > { %5619 = vst [vmem:[#allocation29_spill] sm:$0xff] %v4580_v43  ;;  %2718 = vmatprep.subr.mxu1 %v1965_v27  ;;  %v1972_v51 = vand.u32 4294901760, %v1971_v5  ;;  %v4593_v33 = vsub.f32 %v1645_v62, %v4580_v43  ;;  %v4597_v27 = vand.u32 4294901760, %v1628_v41  ;;  %2686 = vmatprep.subr.mxu0 %v4580_v43  ;;  %v1978_v25 = vsub.f32 %v4568_v36, %v5154_v6 }
 0x124   : > { %2719 = vmatpush3.msra.mxu1 %v1853_v12  ;;  %v1859_v60 = vsub.f32 %v4558_v39, %v5149_v32  ;;  %5623 = vst [vmem:[#allocation33_spill] sm:$0xff] %v4595_v54  ;;  %v5157_v5 = vand.u32 4294901760, %v4584_v17  ;;  %v4605_v12 = vsub.f32 %v1629_v58, %v4586_v57  ;;  %2687 = vmatpush3.msra.mxu0 %v4586_v57 }
 0x125   : > { %5622 = vst [vmem:[#allocation10_spill] sm:$0xff] %v4593_v33  ;;  %5624 = vst [vmem:[#allocation11_spill] sm:$0xff] %v4597_v27  ;;  %2720 = vmatprep.subr.mxu1 %v1972_v51  ;;  %v5158_v32 = vand.u32 4294901760, %v4593_v33  ;;  %v4610_v39 = vsub.f32 %v1644_v40, %v4595_v54  ;;  %v4613_v49 = vsub.f32 %v1628_v41, %v4597_v27  ;;  %2688 = vmatprep.subr.mxu0 %v4595_v54  ;;  %v2912_v54 = vld [vmem:[%s3755_s27 + $0x8] sm:$0xff] }
 0x126   : > { %5625 = vst [vmem:[#allocation35_spill] sm:$0xff] %v4605_v12  ;;  %v1860_v62 = vand.u32 4294901760, %v1859_v60  ;;  %v1979_v51 = vand.u32 4294901760, %v1978_v25  ;;  %v1866_v6 = vsub.f32 %v4584_v17, %v5157_v5  ;;  %2689 = vmatpush3.msra.mxu0 %v4597_v27  ;;  %v5163_v40 = vand.u32 4294901760, %v4605_v12  ;;  %v1643_v25 = vld [vmem:[%s4913_s2 + $0x88] sm:$0xff] }
 0x127   : > { %5626 = vst [vmem:[#allocation12_spill] sm:$0xff] %v4610_v39  ;;  %5627 = vst [vmem:[#allocation37_spill] sm:$0xff] %v4613_v49  ;;  %v1985_v58 = vsub.f32 %v4593_v33, %v5158_v32  ;;  %v5168_v60 = vand.u32 4294901760, %v4610_v39  ;;  %v5171_v41 = vand.u32 4294901760, %v4613_v49  ;;  %v1607_v31 = vmul.f32 %v2912_v54, %v2912_v54 }
 0x128   : > { %2721 = vmatpush3.msra.mxu1 %v1860_v62  ;;  %v1867_v36 = vand.u32 4294901760, %v1866_v6  ;;  %v1627_v62 = vld [vmem:[%s4913_s2 + $0x8] sm:$0xff]  ;;  %v1873_v32 = vsub.f32 %v4605_v12, %v5163_v40  ;;  %v1642_v6 = vld [vmem:[%s4913_s2 + $0x80] sm:$0xff]  ;;  %v1608_v26 = vmul.f32 %v5636_v22, %v5636_v22 }
 0x129   : > { %2722 = vmatprep.subr.mxu1 %v1979_v51  ;;  %v1986_v5 = vand.u32 4294901760, %v1985_v58  ;;  %v1992_v33 = vsub.f32 %v4610_v39, %v5168_v60  ;;  %v1880_v17 = vsub.f32 %v4613_v49, %v5171_v41  ;;  %v4644_v51 = vand.u32 4294901760, %v1643_v25  ;;  %v1626_v58 = vld [vmem:[%s4913_s2] sm:$0xff] }
 0x12a   : > { %2723 = vmatpush3.msra.mxu1 %v1867_v36  ;;  %v1874_v40 = vand.u32 4294901760, %v1873_v32  ;;  %v4649_v60 = vand.u32 4294901760, %v1627_v62  ;;  %v4654_v41 = vand.u32 4294901760, %v1642_v6  ;;  %v4660_v49 = vand.u32 4294901760, %v1626_v58 }
 0x12b   : > { %5628 = vst [vmem:[#allocation13_spill] sm:$0xff] %v4644_v51  ;;  %2724 = vmatprep.subr.mxu1 %v1986_v5  ;;  %v1993_v12 = vand.u32 4294901760, %v1992_v33  ;;  %v1881_v27 = vand.u32 4294901760, %v1880_v17  ;;  %v4652_v39 = vsub.f32 %v1643_v25, %v4644_v51  ;;  %2690 = vmatprep.subr.mxu0 %v4644_v51  ;;  %v1611_v47 = vmul.f32 %v1607_v31, %v1607_v31 }
 0x12c   : > { %5629 = vst [vmem:[#allocation39_spill] sm:$0xff] %v4649_v60  ;;  %5631 = vst [vmem:[#allocation41_spill] sm:$0xff] %v4654_v41  ;;  %2725 = vmatpush3.msra.mxu1 %v1874_v40  ;;  %v4658_v36 = vsub.f32 %v1627_v62, %v4649_v60  ;;  %2691 = vmatpush3.msra.mxu0 %v4649_v60  ;;  %v4665_v32 = vsub.f32 %v1642_v6, %v4654_v41 }
 0x12d   : > { %5630 = vst [vmem:[#allocation14_spill] sm:$0xff] %v4652_v39  ;;  %5633 = vst [vmem:[#allocation43_spill] sm:$0xff] %v4660_v49  ;;  %2726 = vmatprep.subr.mxu1 %v1993_v12  ;;  %v5174_v17 = vand.u32 4294901760, %v4652_v39  ;;  %2692 = vmatprep.subr.mxu0 %v4654_v41  ;;  %v4670_v5 = vsub.f32 %v1626_v58, %v4660_v49 }
 0x12e   : > { %5632 = vst [vmem:[#allocation15_spill] sm:$0xff] %v4658_v36  ;;  %5634 = vst [vmem:[#allocation16_spill] sm:$0xff] %v4665_v32  ;;  %2727 = vmatpush3.msra.mxu1 %v1881_v27  ;;  %v5178_v33 = vand.u32 4294901760, %v4658_v36  ;;  %2693 = vmatpush3.msra.mxu0 %v4660_v49  ;;  %v5185_v12 = vand.u32 4294901760, %v4665_v32 }
 0x12f   : > { %5635 = vst [vmem:[#allocation45_spill] sm:$0xff] %v4670_v5  ;;  %v1999_v40 = vsub.f32 %v4652_v39, %v5174_v17  ;;  %2738 = vmatprep.subr.mxu0 %v4308_v9  ;;  %v5190_v27 = vand.u32 4294901760, %v4670_v5 }
 0x130   : > { %v1887_v25 = vsub.f32 %v4658_v36, %v5178_v33  ;;  %v2006_v6 = vsub.f32 %v4665_v32, %v5185_v12 }
 0x131   : > { %v2000_v62 = vand.u32 4294901760, %v1999_v40  ;;  %v1894_v17 = vsub.f32 %v4670_v5, %v5190_v27 }
 0x132   : > { %v1888_v58 = vand.u32 4294901760, %v1887_v25  ;;  %v2007_v39 = vand.u32 4294901760, %v2006_v6 }
 0x133   : > { %2728 = vmatprep.subr.mxu1 %v2000_v62  ;;  %v1895_v9 = vand.u32 4294901760, %v1894_v17 }
 0x134   : > { %2729 = vmatpush3.msra.mxu1 %v1888_v58  ;;  %v400_v33 = vpop.f32.mrf.mxu0 }
 0x135   : > { %2730 = vmatprep.subr.mxu1 %v2007_v39 }
 0x136   : > { %2731 = vmatpush3.msra.mxu1 %v1895_v9  ;;  %v402_v40 = vpop.f32.mrf.mxu0  ;;  %v2911_v9 = vld [vmem:[%s3755_s27] sm:$0xff] }
 0x137   : > { %2776 = vmatprep.subr.mxu1 %v4280_v21  ;;  %v1606_v5 = vmul.f32 %v2911_v9, %v2911_v9 }
 0x139   : > { %v1610_v19 = vmul.f32 %v1606_v5, %v1606_v5 }
 0x13b   : > { %v809_v49 = vpop.f32.mrf.mxu1  ;;  %v1614_v44 = vmul.f32 6.975, %v1610_v19 }
 0x13c   : > { %v810_v21 = vadd.f32 %v809_v49, %v400_v33  ;;  %v1609_v49 = vmul.f32 %v2913_v61, %v2913_v61 }
 0x13d   : > { %v811_v25 = vpop.f32.mrf.mxu1 }
 0x13e   : > { %v812_v57 = vadd.f32 %v811_v25, %v402_v40  ;;  %v1612_v40 = vmul.f32 %v1608_v26, %v1608_v26 }
 0x170   : > { %v416_v36 = vpop.f32.mrf.mxu0 }
 0x172   : > { %v418_v41 = vpop.f32.mrf.mxu0 }
 0x176   : > { %v1020_v12 = vpop.f32.mrf.mxu0 }
 0x177   : > { %v817_v32 = vpop.f32.mrf.mxu1  ;;  %v1021_v56 = vadd.f32 %v1020_v12, %v810_v21 }
 0x178   : > { %v1022_v60 = vpop.f32.mrf.mxu0  ;;  %v818_v43 = vadd.f32 %v817_v32, %v416_v36 }
 0x179   : > { %v819_v27 = vpop.f32.mrf.mxu1  ;;  %v1023_v59 = vadd.f32 %v1022_v60, %v812_v57  ;;  %v1615_v57 = vmul.f32 6.975, %v1611_v47 }
 0x17a   : > { %v820_v20 = vadd.f32 %v819_v27, %v418_v41 }
 0x17c   : > { %v1030_v62 = vpop.f32.mrf.mxu0 }
 0x17d   : > { %v1031_v33 = vadd.f32 %v1030_v62, %v818_v43  ;;  %v1616_v43 = vmul.f32 6.975, %v1612_v40 }
 0x17e   : > { %v1032_v58 = vpop.f32.mrf.mxu0 }
 0x17f   : > { %v1033_v21 = vadd.f32 %v1032_v58, %v820_v20 }
 0x180   : > { %v1171_v6 = vpop.f32.mrf.mxu1 }
 0x181   : > { %v1172_v23 = vadd.f32 %v1171_v6, %v1021_v56  ;;  %v1613_v56 = vmul.f32 %v1609_v49, %v1609_v49 }
 0x182   : > { %v1173_v17 = vpop.f32.mrf.mxu1 }
 0x183   : > { %v1174_v1 = vadd.f32 %v1173_v17, %v1023_v59  ;;  %v1617_v20 = vmul.f32 6.975, %v1613_v56 }
 0x186   : > { %v1183_v51 = vpop.f32.mrf.mxu1 }
 0x187   : > { %v1184_v36 = vadd.f32 %v1183_v51, %v1031_v33 }
 0x188   : > { %v1185_v24 = vpop.f32.mrf.mxu1 }
 0x189   : > { %v1186_v60 = vadd.f32 %v1185_v24, %v1033_v21 }
 0x1ba   : > { %v1448_v39 = vpop.f32.mrf.mxu0 }
 0x1bb   : > { %v1449_v4 = vadd.f32 %v1448_v39, %v1172_v23 }
 0x1bc   : > { %v1450_v37 = vpop.f32.mrf.mxu0 }
 0x1bd   : > { %v1451_v32 = vadd.f32 %v1450_v37, %v1174_v1  ;;  %v2914_v1 = vld [vmem:[%s3755_s27 + $0x10] sm:$0xff]  ;;  %s2658_s27 = sshll.u32 %s5719_s23, 3 }
 0x1be   : > { %v1456_v35 = vpop.f32.mrf.mxu0  ;;  %s190_s20 = scalar_lea.vmem %s4914_s3, %s2658_s27 }
 0x1bf   : > { %v1457_v41 = vadd.f32 %v1456_v35, %v1184_v36 }
 0x1c0   : > { %v1458_v12 = vpop.f32.mrf.mxu0 }
 0x1c1   : > { %v1459_v59 = vadd.f32 %v1458_v12, %v1186_v60  ;;  %v5640_v60 = vld [vmem:[#allocation68_spill] sm:$0xff] }
 0x1c3   : > { %v1593_v28 = vpop.f32.mrf.mxu1 }
 0x1c4   : > { %v1594_v5 = vadd.f32 %v1593_v28, %v1449_v4 }
 0x1c5   : > { %v1595_v22 = vpop.f32.mrf.mxu1 }
 0x1c6   : > { %v1618_v31 = vmul.f32 %v2911_v9, %v1594_v5  ;;  %v1596_v27 = vadd.f32 %v1595_v22, %v1451_v32 }
 0x1c7   : > { %v1601_v25 = vpop.f32.mrf.mxu1 }
 0x1c8   : > { %v1622_v23 = vsub.f32 %v1614_v44, %v1618_v31  ;;  %v1619_v62 = vmul.f32 %v2912_v54, %v1596_v27  ;;  %v1602_v19 = vadd.f32 %v1601_v25, %v1457_v41  ;;  %v5641_v41 = vld [vmem:[#allocation52_spill] sm:$0xff]  ;;  %v5643_v27 = vld [vmem:[#allocation58_spill] sm:$0xff] }
 0x1c9   : > { %v1603_v26 = vpop.f32.mrf.mxu1  ;;  %v5642_v31 = vld [vmem:[#allocation72_spill] sm:$0xff] }
 0x1ca   : > { %v4694_v51 = vand.u32 4294901760, %v1622_v23  ;;  %v1623_v28 = vsub.f32 %v1615_v57, %v1619_v62  ;;  %v1620_v37 = vmul.f32 %v2914_v1, %v1602_v19  ;;  %v1604_v47 = vadd.f32 %v1603_v26, %v1459_v59  ;;  %v5644_v25 = vld [vmem:[#allocation76_spill] sm:$0xff]  ;;  %v5646_v59 = vld [vmem:[#allocation85_spill] sm:$0xff]  ;;  %v5648_v62 = vld [vmem:[#allocation6_spill] sm:$0xff] }
 0x1cb   : > { %v5649_v19 = vld [vmem:[#allocation64_spill] sm:$0xff]  ;;  %v5650_v26 = vld [vmem:[#allocation25_spill] sm:$0xff]  ;;  %v5653_v1 = vld [vmem:[#allocation70_spill] sm:$0xff] }
 0x1cc   : > { %5637 = vst [vmem:[#allocation17_spill] sm:$0xff] %v4694_v51  ;;  %v4698_v4 = vsub.f32 %v1622_v23, %v4694_v51  ;;  %v4700_v24 = vand.u32 4294901760, %v1623_v28  ;;  %v1624_v35 = vsub.f32 %v1616_v43, %v1620_v37  ;;  %v1621_v6 = vmul.f32 %v2913_v61, %v1604_v47  ;;  %v5645_v43 = vld [vmem:[#allocation60_spill] sm:$0xff]  ;;  %v5647_v23 = vld [vmem:[#allocation62_spill] sm:$0xff]  ;;  %v5654_v37 = vld [vmem:[#allocation29_spill] sm:$0xff] }
 0x1cd   : > { %v5655_v47 = vld [vmem:[#allocation74_spill] sm:$0xff] }
 0x1ce   : > { %v1762_v58 = vand.u32 4294901760, %v4698_v4  ;;  %v1755_v54 = vsub.f32 %v1623_v28, %v4700_v24  ;;  %v4704_v44 = vand.u32 4294901760, %v1624_v35  ;;  %v1625_v17 = vsub.f32 %v1617_v20, %v1621_v6  ;;  %2010 = vmatprep.mubr.f32.mxu1 %v4700_v24  ;;  %v5651_v20 = vld [vmem:[#allocation66_spill] sm:$0xff]  ;;  %v5652_v28 = vld [vmem:[#allocation8_spill] sm:$0xff]  ;;  %v5657_v6 = vld [vmem:[#allocation83_spill] sm:$0xff] }
 0x1cf   : > { %2012 = vmatmul.mubr.f32.vlgmr.msra.gmra.mxu1 %v4694_v51  ;;  %v5673_v51 = vld [vmem:[#allocation12_spill] sm:$0xff] }
 0x1d0   : > { %5638 = vst [vmem:[#allocation47_spill] sm:$0xff] %v4704_v44  ;;  %v4709_v39 = vsub.f32 %v1624_v35, %v4704_v44  ;;  %v4711_v9 = vand.u32 4294901760, %v1625_v17  ;;  %2777 = vmatpush3.msra.mxu1 %v4282_v46  ;;  %v1756_v49 = vand.u32 4294901760, %v1755_v54  ;;  %v1763_v61 = vsub.f32 %v4698_v4, %v1762_v58  ;;  %v5656_v35 = vld [vmem:[#allocation31_spill] sm:$0xff] }
 0x1d1   : > { %2778 = vmatprep.subr.mxu1 %v4284_v29 }
 0x1d2   : > { %5639 = vst [vmem:[#allocation18_spill] sm:$0xff] %v4711_v9  ;;  %v4719_v33 = vsub.f32 %v1625_v17, %v4711_v9  ;;  %2779 = vmatpush3.msra.mxu1 %v4295_v2  ;;  %2017 = vmatprep.mubr.f32.mxu1 %v4711_v9  ;;  %v1757_v40 = vsub.f32 %v1755_v54, %v1756_v49  ;;  %v5236_v21 = vand.u32 4294901760, %v4709_v39  ;;  %v1764_v5 = vand.u32 4294901760, %v1763_v61  ;;  %v5659_v17 = vld [vmem:[#allocation87_spill] sm:$0xff] }
 0x1d3   : > { %2780 = vmatprep.subr.mxu1 %v4297_v18  ;;  %2019 = vmatmul.mubr.f32.gmra.mxu1 %v4704_v44  ;;  %v5661_v61 = vld [vmem:[#allocation23_spill] sm:$0xff] }
 0x1d4   : > { %2781 = vmatpush3.msra.mxu1 %v4299_v0  ;;  %2270 = vmatprep.mubr.f32.mxu1 %v1756_v49  ;;  %v1758_v36 = vand.u32 4294901760, %v1757_v40  ;;  %v5237_v32 = vand.u32 4294901760, %v4719_v33  ;;  %v1778_v22 = vsub.f32 %v4709_v39, %v5236_v21  ;;  %v5660_v49 = vld [vmem:[#allocation11_spill] sm:$0xff]  ;;  %v5662_v40 = vld [vmem:[#allocation13_spill] sm:$0xff]  ;;  %v5669_v21 = vld [vmem:[#allocation10_spill] sm:$0xff]  ;;  %v5672_v9 = vand.u32 4294901760, %v4719_v33 }
 0x1d5   : > { %2782 = vmatprep.subr.mxu1 %v4316_v11  ;;  %v5671_v44 = vld [vmem:[#allocation35_spill] sm:$0xff] }
 0x1d6   : > { %2783 = vmatpush3.msra.mxu1 %v4328_v16  ;;  %1759 = vmatprep.mubr.f32.mxu0 %v1758_v36  ;;  %v1772_v12 = vsub.f32 %v4719_v33, %v5237_v32  ;;  %v1779_v56 = vand.u32 4294901760, %v1778_v22  ;;  %v5663_v36 = vld [vmem:[#allocation7_spill] sm:$0xff]  ;;  %v5666_v22 = vld [vmem:[#allocation41_spill] sm:$0xff]  ;;  %v5670_v32 = vld [vmem:[#allocation44_spill] sm:$0xff] }
 0x1d7   : > { %2784 = vmatprep.subr.mxu1 %v4390_v3  ;;  %1765 = vmatmul.mubr.f32.vlgmr.msra.gmra.mxu0 %v1764_v5  ;;  %v5664_v5 = vld [vmem:[#allocation39_spill] sm:$0xff] }
 0x1d8   : > { %2739 = vmatpush3.msra.mxu0 %v4311_v8  ;;  %2785 = vmatpush3.msra.mxu1 %v4392_v13  ;;  %v1773_v57 = vand.u32 4294901760, %v1772_v12  ;;  %v5665_v12 = vld [vmem:[#allocation27_spill] sm:$0xff] }
 0x1d9   : > { %2740 = vmatprep.subr.mxu0 %v4314_v10  ;;  %2786 = vmatprep.subr.mxu1 %v4394_v50 }
 0x1da   : > { %2741 = vmatpush3.msra.mxu0 %v4320_v15  ;;  %2787 = vmatpush3.msra.mxu1 %v4396_v52 }
 0x1db   : > { %1774 = vmatprep.mubr.f32.mxu0 %v1773_v57  ;;  %2742 = vmatprep.subr.mxu0 %v4323_v42  ;;  %v5667_v57 = vld [vmem:[#allocation9_spill] sm:$0xff] }
 0x1dc   : > { %2788 = vmatprep.subr.mxu1 %v4398_v7  ;;  %1780 = vmatmul.mubr.f32.gmra.mxu0 %v1779_v56  ;;  %v5668_v56 = vld [vmem:[#allocation43_spill] sm:$0xff] }
 0x1dd   : > { %2743 = vmatpush3.msra.mxu0 %v4326_v48  ;;  %2789 = vmatpush3.msra.mxu1 %v4443_v34 }
 0x1de   : > { %2744 = vmatprep.subr.mxu0 %v4335_v63  ;;  %2154 = vmatprep.mubr.f32.mxu0 %v1755_v54  ;;  %v5658_v54 = vld [vmem:[#allocation33_spill] sm:$0xff] }
 0x1df   : > { %2790 = vmatprep.subr.mxu1 %v4448_v30  ;;  %2745 = vmatpush3.msra.mxu0 %v4342_v55 }
 0x1e0   : > { %2791 = vmatpush3.msra.mxu1 %v4456_v53  ;;  %2746 = vmatprep.subr.mxu0 %v4401_v14 }
 0x1e1   : > { %2792 = vmatprep.subr.mxu1 %v4465_v45  ;;  %2747 = vmatpush3.msra.mxu0 %v4404_v38 }
 0x1e2   : > { %2793 = vmatpush3.msra.mxu1 %v5640_v60  ;;  %2748 = vmatprep.subr.mxu0 %v5641_v41 }
 0x1e3   : > { %2794 = vmatprep.subr.mxu1 %v5642_v31  ;;  %2749 = vmatpush3.msra.mxu0 %v5643_v27 }
 0x1e4   : > { %2795 = vmatpush3.msra.mxu1 %v5644_v25  ;;  %2750 = vmatprep.subr.mxu0 %v5645_v43 }
 0x1e5   : > { %2796 = vmatprep.subr.mxu1 %v5646_v59  ;;  %2751 = vmatpush3.msra.mxu0 %v5647_v23 }
 0x1e6   : > { %2797 = vmatpush3.msra.mxu1 %v5648_v62  ;;  %2752 = vmatprep.subr.mxu0 %v5649_v19 }
 0x1e7   : > { %2798 = vmatprep.subr.mxu1 %v5650_v26  ;;  %2753 = vmatpush3.msra.mxu0 %v5651_v20 }
 0x1e8   : > { %2799 = vmatpush3.msra.mxu1 %v5652_v28  ;;  %2754 = vmatprep.subr.mxu0 %v5653_v1 }
 0x1e9   : > { %2800 = vmatprep.subr.mxu1 %v5654_v37  ;;  %2755 = vmatpush3.msra.mxu0 %v5655_v47 }
 0x1ea   : > { %2801 = vmatpush3.msra.mxu1 %v5656_v35  ;;  %2756 = vmatprep.subr.mxu0 %v5657_v6 }
 0x1eb   : > { %2802 = vmatprep.subr.mxu1 %v5658_v54  ;;  %2757 = vmatpush3.msra.mxu0 %v5659_v17 }
 0x1ec   : > { %2803 = vmatpush3.msra.mxu1 %v5660_v49  ;;  %2758 = vmatprep.subr.mxu0 %v5661_v61 }
 0x1ed   : > { %2804 = vmatprep.subr.mxu1 %v5662_v40  ;;  %2759 = vmatpush3.msra.mxu0 %v5663_v36 }
 0x1ee   : > { %2805 = vmatpush3.msra.mxu1 %v5664_v5  ;;  %2760 = vmatprep.subr.mxu0 %v5665_v12 }
 0x1ef   : > { %2806 = vmatprep.subr.mxu1 %v5666_v22  ;;  %2761 = vmatpush3.msra.mxu0 %v5667_v57  ;;  %v5674_v57 = vld [vmem:[#allocation37_spill] sm:$0xff] }
 0x1f0   : > { %2807 = vmatpush3.msra.mxu1 %v5668_v56  ;;  %2762 = vmatprep.subr.mxu0 %v5669_v21  ;;  %v5675_v21 = vld [vmem:[#allocation14_spill] sm:$0xff] }
 0x1f1   : > { %2274 = vmatmul.mubr.f32.vlgmr.msra.gmra.mxu1 %v1762_v58  ;;  %2852 = vmatprep.subr.mxu1 %v5670_v32  ;;  %v5676_v58 = vand.u32 4294901760, %v4709_v39  ;;  %v5677_v32 = vld [vmem:[#allocation15_spill] sm:$0xff] }
 0x1f2   : > { %2763 = vmatpush3.msra.mxu0 %v5671_v44  ;;  %2281 = vmatprep.mubr.f32.mxu1 %v5672_v9 }
 0x1f3   : > { %2853 = vmatpush3.msra.mxu1 %v4282_v46  ;;  %2764 = vmatprep.subr.mxu0 %v5673_v51  ;;  %v5678_v46 = vld [vmem:[#allocation16_spill] sm:$0xff] }
 0x1f4   : > { %2854 = vmatprep.subr.mxu1 %v4284_v29  ;;  %2765 = vmatpush3.msra.mxu0 %v5674_v57  ;;  %v5679_v29 = vld [vmem:[#allocation45_spill] sm:$0xff] }
 0x1f5   : > { %2855 = vmatpush3.msra.mxu1 %v4295_v2  ;;  %2766 = vmatprep.subr.mxu0 %v5675_v21  ;;  %v5680_v2 = vld [vmem:[#allocation82_spill] sm:$0xff] }
 0x1f6   : > { %2285 = vmatmul.mubr.f32.gmra.mxu1 %v5676_v58  ;;  %2856 = vmatprep.subr.mxu1 %v4297_v18  ;;  %v5681_v9 = vand.u32 4294901760, %v5680_v2  ;;  %v5682_v18 = vand.u32 4294901760, %v4311_v8  ;;  %v5686_v8 = vand.u32 4294901760, %v4326_v48  ;;  %v5690_v48 = vand.u32 4294901760, %v4404_v38 }
 0x1f7   : > { %2767 = vmatpush3.msra.mxu0 %v5677_v32  ;;  %2857 = vmatpush3.msra.mxu1 %v4299_v0  ;;  %v5683_v0 = vand.u32 4294901760, %v4314_v10  ;;  %v5687_v10 = vand.u32 4294901760, %v4335_v63  ;;  %v5691_v63 = vand.u32 4294901760, %v5641_v41  ;;  %v5699_v38 = vand.u32 4294901760, %v5657_v6 }
 0x1f8   : > { %2562 = vmatprep.mubr.f32.mxu1 %v4700_v24  ;;  %2768 = vmatprep.subr.mxu0 %v5678_v46  ;;  %v5709_v41 = vand.u32 4294901760, %v5671_v44  ;;  %v5717_v44 = vand.u32 4294901760, %v5679_v29 }
 0x1f9   : > { %2858 = vmatprep.subr.mxu1 %v4316_v11  ;;  %2769 = vmatpush3.msra.mxu0 %v5679_v29  ;;  %v5684_v11 = vand.u32 4294901760, %v4320_v15  ;;  %v5688_v15 = vand.u32 4294901760, %v4342_v55  ;;  %v5692_v55 = vand.u32 4294901760, %v5643_v27  ;;  %v5711_v27 = vand.u32 4294901760, %v5673_v51 }
 0x1fa   : > { %2859 = vmatpush3.msra.mxu1 %v4328_v16  ;;  %2157 = vmatmul.mubr.f32.vlgmr.msra.gmra.mxu0 %v4698_v4  ;;  %v5685_v16 = vand.u32 4294901760, %v4323_v42  ;;  %v5689_v42 = vand.u32 4294901760, %v4401_v14  ;;  %v5698_v14 = vand.u32 4294901760, %v5655_v47  ;;  %v5704_v4 = vld [vmem:[#allocation9_spill] sm:$0xff] }
 0x1fb   : > { %2814 = vmatprep.subr.mxu0 %v5681_v9  ;;  %2860 = vmatprep.subr.mxu1 %v4390_v3  ;;  %v5693_v3 = vand.u32 4294901760, %v5645_v43  ;;  %v5713_v43 = vand.u32 4294901760, %v5675_v21 }
 0x1fc   : > { %2163 = vmatprep.mubr.f32.mxu0 %v4719_v33  ;;  %2815 = vmatpush3.msra.mxu0 %v5682_v18 }
 0x1fd   : > { %2861 = vmatpush3.msra.mxu1 %v4392_v13  ;;  %2816 = vmatprep.subr.mxu0 %v5683_v0  ;;  %v5694_v13 = vand.u32 4294901760, %v5647_v23  ;;  %v5715_v23 = vand.u32 4294901760, %v5677_v32 }
 0x1fe   : > { %2862 = vmatprep.subr.mxu1 %v4394_v50  ;;  %2817 = vmatpush3.msra.mxu0 %v5684_v11  ;;  %v5695_v50 = vand.u32 4294901760, %v5649_v19 }
 0x1ff   : > { %2863 = vmatpush3.msra.mxu1 %v4396_v52  ;;  %2166 = vmatmul.mubr.f32.gmra.mxu0 %v4709_v39  ;;  %v5696_v52 = vand.u32 4294901760, %v5651_v20  ;;  %v5706_v39 = vld [vmem:[#allocation10_spill] sm:$0xff] }
 0x200   : > { %2818 = vmatprep.subr.mxu0 %v5685_v16  ;;  %2864 = vmatprep.subr.mxu1 %v4398_v7  ;;  %v5697_v7 = vand.u32 4294901760, %v5653_v1  ;;  %v5707_v33 = vand.u32 4294901760, %v5706_v39 }
 0x201   : > { %2819 = vmatpush3.msra.mxu0 %v5686_v8  ;;  %2451 = vmatprep.mubr.f32.mxu0 %v4700_v24  ;;  %v5705_v24 = vand.u32 4294901760, %v5704_v4 }
 0x202   : > { %2865 = vmatpush3.msra.mxu1 %v4443_v34  ;;  %2820 = vmatprep.subr.mxu0 %v5687_v10  ;;  %v5700_v34 = vand.u32 4294901760, %v5659_v17 }
 0x203   : > { %2866 = vmatprep.subr.mxu1 %v4448_v30  ;;  %2821 = vmatpush3.msra.mxu0 %v5688_v15  ;;  %v5701_v30 = vand.u32 4294901760, %v5661_v61 }
 0x204   : > { %2867 = vmatpush3.msra.mxu1 %v4456_v53  ;;  %2822 = vmatprep.subr.mxu0 %v5689_v42  ;;  %v5702_v53 = vand.u32 4294901760, %v5663_v36 }
 0x205   : > { %2868 = vmatprep.subr.mxu1 %v4465_v45  ;;  %2823 = vmatpush3.msra.mxu0 %v5690_v48  ;;  %v5703_v45 = vand.u32 4294901760, %v5665_v12 }
 0x206   : > { %2869 = vmatpush3.msra.mxu1 %v5640_v60  ;;  %2824 = vmatprep.subr.mxu0 %v5691_v63  ;;  %v5708_v60 = vld [vmem:[#allocation17_spill] sm:$0xff] }
 0x207   : > { %2870 = vmatprep.subr.mxu1 %v5642_v31  ;;  %2825 = vmatpush3.msra.mxu0 %v5692_v55  ;;  %v5710_v31 = vld [vmem:[#allocation18_spill] sm:$0xff] }
 0x208   : > { %2871 = vmatpush3.msra.mxu1 %v5644_v25  ;;  %2826 = vmatprep.subr.mxu0 %v5693_v3  ;;  %v5712_v25 = vand.u32 4294901760, %v5674_v57 }
 0x209   : > { %2872 = vmatprep.subr.mxu1 %v5646_v59  ;;  %2827 = vmatpush3.msra.mxu0 %v5694_v13  ;;  %v5714_v59 = vld [vmem:[#allocation47_spill] sm:$0xff] }
 0x20a   : > { %2873 = vmatpush3.msra.mxu1 %v5648_v62  ;;  %2828 = vmatprep.subr.mxu0 %v5695_v50  ;;  %v5716_v62 = vand.u32 4294901760, %v5678_v46 }
 0x20b   : > { %2874 = vmatprep.subr.mxu1 %v5650_v26  ;;  %2829 = vmatpush3.msra.mxu0 %v5696_v52 }
 0x20c   : > { %2875 = vmatpush3.msra.mxu1 %v5652_v28  ;;  %2830 = vmatprep.subr.mxu0 %v5697_v7 }
 0x20d   : > { %2876 = vmatprep.subr.mxu1 %v5654_v37  ;;  %2831 = vmatpush3.msra.mxu0 %v5698_v14 }
 0x20e   : > { %2877 = vmatpush3.msra.mxu1 %v5656_v35  ;;  %2832 = vmatprep.subr.mxu0 %v5699_v38 }
 0x20f   : > { %2878 = vmatprep.subr.mxu1 %v5658_v54  ;;  %2833 = vmatpush3.msra.mxu0 %v5700_v34 }
 0x210   : > { %2879 = vmatpush3.msra.mxu1 %v5660_v49  ;;  %2834 = vmatprep.subr.mxu0 %v5701_v30 }
 0x211   : > { %2880 = vmatprep.subr.mxu1 %v5662_v40  ;;  %2835 = vmatpush3.msra.mxu0 %v5702_v53 }
 0x212   : > { %2881 = vmatpush3.msra.mxu1 %v5664_v5  ;;  %2836 = vmatprep.subr.mxu0 %v5703_v45 }
 0x213   : > { %2882 = vmatprep.subr.mxu1 %v5666_v22  ;;  %2837 = vmatpush3.msra.mxu0 %v5705_v24 }
 0x214   : > { %2883 = vmatpush3.msra.mxu1 %v5668_v56  ;;  %2838 = vmatprep.subr.mxu0 %v5707_v33 }
 0x215   : > { %2564 = vmatmul.mubr.f32.vlgmr.msra.gmra.mxu1 %v5708_v60  ;;  %2839 = vmatpush3.msra.mxu0 %v5709_v41 }
 0x216   : > { %2569 = vmatprep.mubr.f32.mxu1 %v5710_v31  ;;  %2840 = vmatprep.subr.mxu0 %v5711_v27 }
 0x217   : > { %2841 = vmatpush3.msra.mxu0 %v5712_v25 }
 0x218   : > { %2842 = vmatprep.subr.mxu0 %v5713_v43 }
 0x219   : > { %2571 = vmatmul.mubr.f32.gmra.mxu1 %v5714_v59  ;;  %2843 = vmatpush3.msra.mxu0 %v5715_v23 }
 0x21a   : > { %2844 = vmatprep.subr.mxu0 %v5716_v62 }
 0x21b   : > { %2845 = vmatpush3.msra.mxu0 %v5717_v44 }
 0x21c   : > { %2453 = vmatmul.mubr.f32.vlgmr.msra.gmra.mxu0 %v5708_v60 }
 0x21d   : > { %2458 = vmatprep.mubr.f32.mxu0 %v5710_v31 }
 0x220   : > { %2460 = vmatmul.mubr.f32.gmra.mxu0 %v5714_v59 }
 0x28f   : > { %v2732_v51 = vpop.f32.mrf.mxu1 }
 0x291   : > { %v2733_v21 = vpop.f32.mrf.mxu1 }
 0x292   : > { %v2734_v5 = vadd.f32 %v2733_v21, %v2732_v51 }
 0x293   : > { %v2735_v26 = vpop.f32.mrf.mxu1 }
 0x295   : > { %v2736_v28 = vpop.f32.mrf.mxu1 }
 0x296   : > { %v2737_v32 = vadd.f32 %v2736_v28, %v2735_v26 }
 0x297   : > { %v2694_v19 = vpop.f32.mrf.mxu0 }
 0x299   : > { %v2695_v20 = vpop.f32.mrf.mxu0 }
 0x29a   : > { %v2696_v40 = vadd.f32 %v2695_v20, %v2694_v19 }
 0x29c   : > { %v2697_v1 = vpop.f32.mrf.mxu0  ;;  %v2014_v57 = vadd.f32 %v2734_v5, %v2696_v40 }
 0x29e   : > { %v2698_v47 = vpop.f32.mrf.mxu0 }
 0x29f   : > { %v2699_v56 = vadd.f32 %v2698_v47, %v2697_v1 }
 0x2a1   : > { %v2021_v9 = vadd.f32 %v2737_v32, %v2699_v56 }
 0x2b1   : > { %v2808_v37 = vpop.f32.mrf.mxu1 }
 0x2b3   : > { %v2809_v35 = vpop.f32.mrf.mxu1 }
 0x2b4   : > { %v2810_v18 = vadd.f32 %v2809_v35, %v2808_v37 }
 0x2b6   : > { %v2811_v54 = vpop.f32.mrf.mxu1 }
 0x2b8   : > { %v2812_v49 = vpop.f32.mrf.mxu1 }
 0x2b9   : > { %v2813_v42 = vadd.f32 %v2812_v49, %v2811_v54 }
 0x2ba   : > { %v2770_v6 = vpop.f32.mrf.mxu0 }
 0x2bc   : > { %v2771_v17 = vpop.f32.mrf.mxu0 }
 0x2bd   : > { %v2772_v12 = vadd.f32 %v2771_v17, %v2770_v6 }
 0x2bf   : > { %v2773_v61 = vpop.f32.mrf.mxu0  ;;  %v2159_v46 = vadd.f32 %v2772_v12, %v2014_v57 }
 0x2c1   : > { %v2774_v22 = vpop.f32.mrf.mxu0  ;;  %v2276_v8 = vadd.f32 %v2810_v18, %v2159_v46 }
 0x2c2   : > { %v2775_v29 = vadd.f32 %v2774_v22, %v2773_v61 }
 0x2c4   : > { %v2168_v16 = vadd.f32 %v2775_v29, %v2021_v9 }
 0x2c6   : > { %v2287_v50 = vadd.f32 %v2813_v42, %v2168_v16 }
 0x2d5   : > { %v2884_v36 = vpop.f32.mrf.mxu1 }
 0x2d7   : > { %v2885_v58 = vpop.f32.mrf.mxu1 }
 0x2d8   : > { %v2886_v48 = vadd.f32 %v2885_v58, %v2884_v36 }
 0x2d9   : > { %v2887_v0 = vpop.f32.mrf.mxu1 }
 0x2db   : > { %v2888_v55 = vpop.f32.mrf.mxu1 }
 0x2dc   : > { %v2846_v2 = vpop.f32.mrf.mxu0  ;;  %v2889_v7 = vadd.f32 %v2888_v55, %v2887_v0 }
 0x2de   : > { %v2847_v11 = vpop.f32.mrf.mxu0 }
 0x2df   : > { %v2848_v10 = vadd.f32 %v2847_v11, %v2846_v2 }
 0x2e0   : > { %v2849_v15 = vpop.f32.mrf.mxu0 }
 0x2e1   : > { %v2455_v63 = vadd.f32 %v2848_v10, %v2276_v8 }
 0x2e2   : > { %v2850_v3 = vpop.f32.mrf.mxu0 }
 0x2e3   : > { %v2566_v13 = vadd.f32 %v2886_v48, %v2455_v63  ;;  %v2851_v52 = vadd.f32 %v2850_v3, %v2849_v15 }
 0x2e5   : > { %2577 = vst.msk [vmem:[%s190_s20] sm:$0xff] %vm2576_vm0, %v2566_v13  ;;  %v2462_v14 = vadd.f32 %v2851_v52, %v2287_v50 }
 0x2e7   : > { %v2573_v38 = vadd.f32 %v2889_v7, %v2462_v14 }
 0x2e9   : > { %2578 = vst.msk [vmem:[%s190_s20 + $0x8] sm:$0xff] %vm2576_vm0, %v2573_v38 }
 0x2ea PF: > { %s14_s12 = sadd.s32 1, %s2951_s12  }
 0x2eb   : > { %p11_p1 = scmp.ge.s32.totalorder %s14_s12, 6  }
 0x2ed   :  { %13 = sbr.rel (!%p11_p1) target bundleno = 1 (0x1), region = 67 }
 0x2f2   :  { %2601 = vsyncpa [#allocation3], 1 }
 0x2f3   :  { %2603 = vsyncpa [#allocation3 + $0x1], 1 }

</bundles_post_ra>
